<compile_context>
chip_gen: v6e
topology: v6e:2x2x1
jax: 0.10.0
libtpu: 0.0.40
codegen_flags: <defaults>
</compile_context>

<pallas_src>
import functools

import jax
import jax.numpy as jnp
from jax.experimental import pallas as pl
from jax.experimental.pallas import tpu as pltpu


D = 256  # hidden size hard-coded by the Manager module


# ----------------------------------------------------------------------------
# Shared per-step math (traced inline in both kernels).
# ----------------------------------------------------------------------------
def _manager_step_math(dilation, z, h, c_prev, hx_all,
                       w_ms, b_ms, w_lstm, b_lstm, w_cr, b_cr):
    # Mspace: Linear(256,256) + ReLU (bf16 weights, f32 MXU accumulate)
    state = jnp.dot(z.astype(jnp.bfloat16), w_ms,
                    preferred_element_type=jnp.float32)
    state = jnp.maximum(state + b_ms, 0.0)

    # LSTMCell: fused K=512 matmul, gates = [state, h] @ [W_ih; W_hh] + b
    xh = jnp.concatenate(
        [state.astype(jnp.bfloat16), h.astype(jnp.bfloat16)], axis=1)  # (B, 2D)
    gates = jnp.dot(xh, w_lstm, preferred_element_type=jnp.float32) + b_lstm
    i_g = jax.nn.sigmoid(gates[:, 0 * D:1 * D])
    f_g = jax.nn.sigmoid(gates[:, 1 * D:2 * D])
    g_g = jnp.tanh(gates[:, 2 * D:3 * D])
    o_g = jax.nn.sigmoid(gates[:, 3 * D:4 * D])
    c_new = f_g * c_prev + i_g * g_g
    h_new = o_g * jnp.tanh(c_new)

    # goal_hat = (h_new + sum of other slots) / dilation ; L2-normalize rows.
    h_rest = jnp.sum(hx_all, axis=0) - h          # hx_all holds the OLD slot
    goal_hat = (h_new + h_rest) * (1.0 / float(dilation))
    sqnorm = jnp.sum(goal_hat * goal_hat, axis=1, keepdims=True)
    # F.normalize: x / max(||x||, 1e-12)  ==  x * rsqrt(max(||x||^2, 1e-24))
    goal = goal_hat * jax.lax.rsqrt(jnp.maximum(sqnorm, 1e-24))

    # critic = Linear(256, 1) on z, as a VPU reduction (no MXU pass for N=1)
    critic = jnp.sum(z * w_cr, axis=1, keepdims=True) + b_cr
    return critic, state, goal, h_new, c_new


# ----------------------------------------------------------------------------
# Single-step kernel: cursor-slot DMA + aliased slot writeback.
# ----------------------------------------------------------------------------
def _manager_step_kernel(dilation,
                         cursor_ref,                                   # SMEM scalar prefetch
                         z_ref, hx_ref, cx_ref,                        # activations / banks
                         w_ms_ref, b_ms_ref, w_lstm_ref, b_lstm_ref,   # bf16 weights + f32 biases
                         w_cr_ref, b_cr_ref,                           # critic row + bias
                         critic_ref, state_ref, goal_ref,
                         hx_out_ref, cx_out_ref):                      # (1,B,D) slot views
    cur = cursor_ref[0]
    z = z_ref[...]                 # (B, D)
    hx_all = hx_ref[...]           # (c, B, D) -- full bank needed for rest-sum
    h = hx_ref[cur]                # (B, D) old hidden of the active slot
    c_prev = cx_ref[0]             # (B, D) only the active slot was DMA'd in

    critic, state, goal, h_new, c_new = _manager_step_math(
        dilation, z, h, c_prev, hx_all,
        w_ms_ref[...], b_ms_ref[...], w_lstm_ref[...], b_lstm_ref[...],
        w_cr_ref[...], b_cr_ref[...])

    state_ref[...] = state
    goal_ref[...] = goal
    critic_ref[...] = critic
    hx_out_ref[0] = h_new          # only this slot is written back (aliased bank)
    cx_out_ref[0] = c_new


def manager_forward(z, hidden, kparams, c):
    """Pallas implementation of Manager.forward (one step).

    z       : (B, 256) f32
    hidden  : (cursor, hx:(c,B,256) f32, cx:(c,B,256) f32)
    kparams : dict from prepare_params()
    returns (critic (B,1), (new_cursor, hx', cx'), state (B,256), goal (B,256))
    """
    cursor, hx, cx = hidden
    B = z.shape[0]
    cursor_arr = jnp.asarray(cursor, jnp.int32).reshape(1)

    grid_spec = pltpu.PrefetchScalarGridSpec(
        num_scalar_prefetch=1,
        grid=(1,),
        in_specs=[
            pl.BlockSpec((B, D), lambda i, cur: (0, 0)),                 # z
            pl.BlockSpec((c, B, D), lambda i, cur: (0, 0, 0)),           # hx (full: rest-sum)
            pl.BlockSpec((1, B, D), lambda i, cur: (cur[0], 0, 0)),      # cx (cursor slot only)
            pl.BlockSpec((D, D), lambda i, cur: (0, 0)),                 # w_ms
            pl.BlockSpec((1, D), lambda i, cur: (0, 0)),                 # b_ms
            pl.BlockSpec((2 * D, 4 * D), lambda i, cur: (0, 0)),         # w_lstm
            pl.BlockSpec((1, 4 * D), lambda i, cur: (0, 0)),             # b_lstm
            pl.BlockSpec((1, D), lambda i, cur: (0, 0)),                 # w_cr
            pl.BlockSpec((1, 1), lambda i, cur: (0, 0)),                 # b_cr
        ],
        out_specs=(
            pl.BlockSpec((B, 1), lambda i, cur: (0, 0)),                 # critic
            pl.BlockSpec((B, D), lambda i, cur: (0, 0)),                 # state
            pl.BlockSpec((B, D), lambda i, cur: (0, 0)),                 # goal
            pl.BlockSpec((1, B, D), lambda i, cur: (cur[0], 0, 0)),      # hx' slot (aliased)
            pl.BlockSpec((1, B, D), lambda i, cur: (cur[0], 0, 0)),      # cx' slot (aliased)
        ),
    )
    out_shapes = (
        jax.ShapeDtypeStruct((B, 1), jnp.float32),
        jax.ShapeDtypeStruct((B, D), jnp.float32),
        jax.ShapeDtypeStruct((B, D), jnp.float32),
        jax.ShapeDtypeStruct((c, B, D), jnp.float32),
        jax.ShapeDtypeStruct((c, B, D), jnp.float32),
    )
    critic, state, goal, hx_new, cx_new = pl.pallas_call(
        functools.partial(_manager_step_kernel, c),
        out_shape=out_shapes,
        grid_spec=grid_spec,
        # flat input indices (scalar-prefetch operand counts): hx=2, cx=3
        input_output_aliases={2: 3, 3: 4},
        compiler_params=pltpu.CompilerParams(
            dimension_semantics=("arbitrary",)),
    )(cursor_arr, z, hx, cx,
      kparams["w_ms"], kparams["b_ms"],
      kparams["w_lstm"], kparams["b_lstm"],
      kparams["w_cr"], kparams["b_cr"])

    new_cursor = (cursor + 1) % c
    return critic, (new_cursor, hx_new, cx_new), state, goal


# ----------------------------------------------------------------------------
# Rollout kernel: T steps in one call, weights resident in VMEM across steps.
# ----------------------------------------------------------------------------
def _manager_rollout_kernel(dilation,
                            cursor0_ref,                               # SMEM scalar prefetch
                            z_ref, hx0_ref, cx0_ref,
                            w_ms_ref, b_ms_ref, w_lstm_ref, b_lstm_ref,
                            w_cr_ref, b_cr_ref,
                            critic_ref, state_ref, goal_ref,
                            hx_ref, cx_ref):                           # resident (c,B,D) banks
    t = pl.program_id(0)
    cur = (cursor0_ref[0] + t) % dilation

    @pl.when(t == 0)
    def _():
        # Load the initial banks into the resident output blocks once.
        hx_ref[...] = hx0_ref[...]
        cx_ref[...] = cx0_ref[...]

    z = z_ref[0]                   # (B, D) for this step
    hx_all = hx_ref[...]           # current bank state (old slot still present)
    h = hx_ref[cur]
    c_prev = cx_ref[cur]

    critic, state, goal, h_new, c_new = _manager_step_math(
        dilation, z, h, c_prev, hx_all,
        w_ms_ref[...], b_ms_ref[...], w_lstm_ref[...], b_lstm_ref[...],
        w_cr_ref[...], b_cr_ref[...])

    hx_ref[cur] = h_new            # update the live bank (writeback once at grid end)
    cx_ref[cur] = c_new
    state_ref[0] = state
    goal_ref[0] = goal
    critic_ref[0] = critic


def manager_rollout(z_seq, hidden, kparams, c):
    """T Manager.forward steps in ONE pallas_call (weights stay in VMEM).

    z_seq   : (T, B, 256) f32
    hidden  : (cursor, hx:(c,B,256), cx:(c,B,256))
    returns (critic (T,B,1), (new_cursor, hx', cx'), state (T,B,256), goal (T,B,256))
    """
    cursor, hx, cx = hidden
    T, B = z_seq.shape[0], z_seq.shape[1]
    cursor_arr = jnp.asarray(cursor, jnp.int32).reshape(1)

    grid_spec = pltpu.PrefetchScalarGridSpec(
        num_scalar_prefetch=1,
        grid=(T,),
        in_specs=[
            pl.BlockSpec((1, B, D), lambda t, cur: (t, 0, 0)),           # z step t
            pl.BlockSpec((c, B, D), lambda t, cur: (0, 0, 0)),           # hx0 (resident)
            pl.BlockSpec((c, B, D), lambda t, cur: (0, 0, 0)),           # cx0 (resident)
            pl.BlockSpec((D, D), lambda t, cur: (0, 0)),                 # w_ms (resident)
            pl.BlockSpec((1, D), lambda t, cur: (0, 0)),                 # b_ms (resident)
            pl.BlockSpec((2 * D, 4 * D), lambda t, cur: (0, 0)),         # w_lstm (resident)
            pl.BlockSpec((1, 4 * D), lambda t, cur: (0, 0)),             # b_lstm (resident)
            pl.BlockSpec((1, D), lambda t, cur: (0, 0)),                 # w_cr (resident)
            pl.BlockSpec((1, 1), lambda t, cur: (0, 0)),                 # b_cr (resident)
        ],
        out_specs=(
            pl.BlockSpec((1, B, 1), lambda t, cur: (t, 0, 0)),           # critic_seq
            pl.BlockSpec((1, B, D), lambda t, cur: (t, 0, 0)),           # state_seq
            pl.BlockSpec((1, B, D), lambda t, cur: (t, 0, 0)),           # goal_seq
            pl.BlockSpec((c, B, D), lambda t, cur: (0, 0, 0)),           # hx bank (resident)
            pl.BlockSpec((c, B, D), lambda t, cur: (0, 0, 0)),           # cx bank (resident)
        ),
    )
    out_shapes = (
        jax.ShapeDtypeStruct((T, B, 1), jnp.float32),
        jax.ShapeDtypeStruct((T, B, D), jnp.float32),
        jax.ShapeDtypeStruct((T, B, D), jnp.float32),
        jax.ShapeDtypeStruct((c, B, D), jnp.float32),
        jax.ShapeDtypeStruct((c, B, D), jnp.float32),
    )
    critic_seq, state_seq, goal_seq, hx_new, cx_new = pl.pallas_call(
        functools.partial(_manager_rollout_kernel, c),
        out_shape=out_shapes,
        grid_spec=grid_spec,
        input_output_aliases={2: 3, 3: 4},    # hx -> hx bank, cx -> cx bank
        compiler_params=pltpu.CompilerParams(
            dimension_semantics=("arbitrary",)),
    )(cursor_arr, z_seq, hx, cx,
      kparams["w_ms"], kparams["b_ms"],
      kparams["w_lstm"], kparams["b_lstm"],
      kparams["w_cr"], kparams["b_cr"])

    new_cursor = (cursor + T) % c
    return critic_seq, (new_cursor, hx_new, cx_new), state_seq, goal_seq


# ----------------------------------------------------------------------------
# Pure-JAX reference (f32 activations, same bf16-rounded weights) + params.
# ----------------------------------------------------------------------------
def _ref_forward(z, hidden, kparams, c):
    cursor, hx, cx = hidden
    w_ms = kparams["w_ms"].astype(jnp.float32)
    w_lstm = kparams["w_lstm"].astype(jnp.float32)

    state = jnp.maximum(z @ w_ms + kparams["b_ms"], 0.0)
    h = hx[cursor]
    cc = cx[cursor]
    gates = jnp.concatenate([state, h], axis=1) @ w_lstm + kparams["b_lstm"]
    i_g, f_g, g_g, o_g = jnp.split(gates, 4, axis=1)
    c_new = jax.nn.sigmoid(f_g) * cc + jax.nn.sigmoid(i_g) * jnp.tanh(g_g)
    h_new = jax.nn.sigmoid(o_g) * jnp.tanh(c_new)
    goal_hat = (h_new + (jnp.sum(hx, axis=0) - h)) / c
    nrm = jnp.maximum(jnp.sqrt(jnp.sum(goal_hat ** 2, axis=1, keepdims=True)), 1e-12)
    goal = goal_hat / nrm
    critic = jnp.sum(z * kparams["w_cr"], axis=1, keepdims=True) + kparams["b_cr"]
    hx_new = hx.at[cursor].set(h_new)
    cx_new = cx.at[cursor].set(c_new)
    return critic, ((cursor + 1) % c, hx_new, cx_new), state, goal


def make_params(key):
    """PyTorch-equivalent f32 parameters, stored transposed as (in, out)."""
    ks = jax.random.split(key, 6)
    scale = 0.05
    return {
        "w_ms": scale * jax.random.normal(ks[0], (D, D), jnp.float32),
        "b_ms": scale * jax.random.normal(ks[1], (1, D), jnp.float32),
        # LSTMCell(256,256): W_ih^T (256,1024), W_hh^T (256,1024), b = b_ih+b_hh
        "w_ih": scale * jax.random.normal(ks[2], (D, 4 * D), jnp.float32),
        "w_hh": scale * jax.random.normal(ks[3], (D, 4 * D), jnp.float32),
        "b_lstm": scale * jax.random.normal(ks[4], (1, 4 * D), jnp.float32),
        # critic Linear(256,1) stored as a row vector (1, 256)
        "w_cr": scale * jax.random.normal(ks[5], (1, D), jnp.float32),
        "b_cr": jnp.zeros((1, 1), jnp.float32),
    }


def prepare_params(p):
    """Kernel-ready params: bf16 matmul weights and fused [W_ih; W_hh]."""
    return {
        "w_ms": p["w_ms"].astype(jnp.bfloat16),
        "b_ms": p["b_ms"],
        "w_lstm": jnp.concatenate([p["w_ih"], p["w_hh"]], axis=0).astype(jnp.bfloat16),
        "b_lstm": p["b_lstm"],
        "w_cr": p["w_cr"],
        "b_cr": p["b_cr"],
    }


def _check(name, a, b, atol, rtol):
    assert jnp.allclose(a, b, atol=atol, rtol=rtol), \
        (name, float(jnp.max(jnp.abs(a - b))))


if __name__ == "__main__":
    B = 4       # batch (TODO(synk): larger B amortizes the fixed dispatch cost)
    c = 4       # dilation / horizon
    T = 6       # rollout length for the multi-step kernel
    cursor = 1  # current dilated-LSTM slot

    key = jax.random.PRNGKey(0)
    kz, khx, kcx, kp, kzs = jax.random.split(key, 5)
    z = jax.random.normal(kz, (B, D), jnp.float32)
    hx = 0.1 * jax.random.normal(khx, (c, B, D), jnp.float32)
    cx = 0.1 * jax.random.normal(kcx, (c, B, D), jnp.float32)
    z_seq = jax.random.normal(kzs, (T, B, D), jnp.float32)
    kparams = prepare_params(make_params(kp))

    # ---- pure-JAX references first (computed from pristine hx/cx) ----
    r_critic, r_hidden, r_state, r_goal = _ref_forward(z, (cursor, hx, cx), kparams, c)
    rh = (cursor, hx, cx)
    r_seq = []
    for t in range(T):
        rc, rh, rs, rg = _ref_forward(z_seq[t], rh, kparams, c)
        r_seq.append((rc, rs, rg))
    r_critic_seq = jnp.stack([o[0] for o in r_seq])
    r_state_seq = jnp.stack([o[1] for o in r_seq])
    r_goal_seq = jnp.stack([o[2] for o in r_seq])

    # ---- single-step kernel (give it its own bank copies; outputs are aliased) ----
    critic, new_hidden, state, goal = manager_forward(
        z, (cursor, hx * 1.0, cx * 1.0), kparams, c)
    jax.block_until_ready((critic, new_hidden[1], new_hidden[2], state, goal))

    assert int(new_hidden[0]) == int(r_hidden[0])
    _check("critic", critic, r_critic, 1e-4, 1e-4)
    # bf16 activations/weights inside the kernel vs f32 reference -> ~1e-2 noise
    for name, a, b in [("state", state, r_state), ("goal", goal, r_goal),
                       ("hx", new_hidden[1], r_hidden[1]),
                       ("cx", new_hidden[2], r_hidden[2])]:
        _check(name, a, b, 3e-2, 3e-2)

    # ---- rollout kernel (weights resident across the T-step grid) ----
    critic_seq, roll_hidden, state_seq, goal_seq = manager_rollout(
        z_seq, (cursor, hx * 1.0, cx * 1.0), kparams, c)
    jax.block_until_ready((critic_seq, roll_hidden[1], roll_hidden[2],
                           state_seq, goal_seq))

    assert int(roll_hidden[0]) == int(rh[0])
    _check("critic_seq", critic_seq, r_critic_seq, 1e-4, 1e-4)
    for name, a, b in [("state_seq", state_seq, r_state_seq),
                       ("goal_seq", goal_seq, r_goal_seq),
                       ("hx_fin", roll_hidden[1], rh[1]),
                       ("cx_fin", roll_hidden[2], rh[2])]:
        _check(name, a, b, 6e-2, 6e-2)

    print("KERNEL_OK")
</pallas_src>

<mosaic_0001>
module attributes {stable_mosaic.version = 11 : i64} {
  func.func @_manager_step_kernel(%arg0: i32, %arg1: memref<1xi32, #tpu.memory_space<smem>>, %arg2: memref<4x256xf32, #tpu.memory_space<vmem>>, %arg3: memref<4x4x256xf32, #tpu.memory_space<vmem>>, %arg4: memref<1x4x256xf32, #tpu.memory_space<vmem>>, %arg5: memref<256x256xbf16, #tpu.memory_space<vmem>>, %arg6: memref<1x256xf32, #tpu.memory_space<vmem>>, %arg7: memref<512x1024xbf16, #tpu.memory_space<vmem>>, %arg8: memref<1x1024xf32, #tpu.memory_space<vmem>>, %arg9: memref<1x256xf32, #tpu.memory_space<vmem>>, %arg10: memref<1x1xf32, #tpu.memory_space<vmem>>, %arg11: memref<4x1xf32, #tpu.memory_space<vmem>>, %arg12: memref<4x256xf32, #tpu.memory_space<vmem>>, %arg13: memref<4x256xf32, #tpu.memory_space<vmem>>, %arg14: memref<1x4x256xf32, #tpu.memory_space<vmem>>, %arg15: memref<1x4x256xf32, #tpu.memory_space<vmem>>) attributes {dimension_semantics = [#tpu.dimension_semantics<arbitrary>], iteration_bounds = array<i64: 1>, scalar_prefetch = 1 : i64, scratch_operands = 0 : i64, tpu.core_type = #tpu.core_type<tc>, window_params = [{pipeline_mode = #tpu.pipeline_mode<synchronous>, transform_indices = @transform_0, window_bounds = array<i64: 4, 256>}, {pipeline_mode = #tpu.pipeline_mode<synchronous>, transform_indices = @transform_1, window_bounds = array<i64: 4, 4, 256>}, {transform_indices = @transform_2, window_bounds = array<i64: 1, 4, 256>}, {pipeline_mode = #tpu.pipeline_mode<synchronous>, transform_indices = @transform_3, window_bounds = array<i64: 256, 256>}, {pipeline_mode = #tpu.pipeline_mode<synchronous>, transform_indices = @transform_4, window_bounds = array<i64: 1, 256>}, {pipeline_mode = #tpu.pipeline_mode<synchronous>, transform_indices = @transform_5, window_bounds = array<i64: 512, 1024>}, {pipeline_mode = #tpu.pipeline_mode<synchronous>, transform_indices = @transform_6, window_bounds = array<i64: 1, 1024>}, {pipeline_mode = #tpu.pipeline_mode<synchronous>, transform_indices = @transform_7, window_bounds = array<i64: 1, 256>}, {pipeline_mode = #tpu.pipeline_mode<synchronous>, transform_indices = @transform_8, window_bounds = array<i64: 1, 1>}, {pipeline_mode = #tpu.pipeline_mode<synchronous>, transform_indices = @transform_9, window_bounds = array<i64: 4, 1>}, {pipeline_mode = #tpu.pipeline_mode<synchronous>, transform_indices = @transform_10, window_bounds = array<i64: 4, 256>}, {pipeline_mode = #tpu.pipeline_mode<synchronous>, transform_indices = @transform_11, window_bounds = array<i64: 4, 256>}, {transform_indices = @transform_12, window_bounds = array<i64: 1, 4, 256>}, {transform_indices = @transform_13, window_bounds = array<i64: 1, 4, 256>}]} {
    %c0 = arith.constant 0 : index
    %0 = memref.load %arg1[%c0] : memref<1xi32, #tpu.memory_space<smem>>
    %c0_0 = arith.constant 0 : index
    %c0_1 = arith.constant 0 : index
    %1 = vector.load %arg2[%c0_0, %c0_1] : memref<4x256xf32, #tpu.memory_space<vmem>>, vector<4x256xf32>
    %c0_2 = arith.constant 0 : index
    %c0_3 = arith.constant 0 : index
    %c0_4 = arith.constant 0 : index
    %2 = vector.load %arg3[%c0_2, %c0_3, %c0_4] : memref<4x4x256xf32, #tpu.memory_space<vmem>>, vector<4x4x256xf32>
    %3 = arith.index_cast %0 : i32 to index
    %c0_5 = arith.constant 0 : index
    %c0_6 = arith.constant 0 : index
    %4 = vector.load %arg3[%3, %c0_5, %c0_6] : memref<4x4x256xf32, #tpu.memory_space<vmem>>, vector<1x4x256xf32>
    %5 = vector.shape_cast %4 : vector<1x4x256xf32> to vector<4x256xf32>
    %c0_7 = arith.constant 0 : index
    %c0_8 = arith.constant 0 : index
    %c0_9 = arith.constant 0 : index
    %6 = vector.load %arg4[%c0_7, %c0_8, %c0_9] : memref<1x4x256xf32, #tpu.memory_space<vmem>>, vector<1x4x256xf32>
    %7 = vector.shape_cast %6 : vector<1x4x256xf32> to vector<4x256xf32>
    %c0_10 = arith.constant 0 : index
    %c0_11 = arith.constant 0 : index
    %8 = vector.load %arg5[%c0_10, %c0_11] : memref<256x256xbf16, #tpu.memory_space<vmem>>, vector<256x256xbf16>
    %c0_12 = arith.constant 0 : index
    %c0_13 = arith.constant 0 : index
    %9 = vector.load %arg6[%c0_12, %c0_13] : memref<1x256xf32, #tpu.memory_space<vmem>>, vector<1x256xf32>
    %c0_14 = arith.constant 0 : index
    %c0_15 = arith.constant 0 : index
    %10 = vector.load %arg7[%c0_14, %c0_15] : memref<512x1024xbf16, #tpu.memory_space<vmem>>, vector<512x1024xbf16>
    %c0_16 = arith.constant 0 : index
    %c0_17 = arith.constant 0 : index
    %11 = vector.load %arg8[%c0_16, %c0_17] : memref<1x1024xf32, #tpu.memory_space<vmem>>, vector<1x1024xf32>
    %c0_18 = arith.constant 0 : index
    %c0_19 = arith.constant 0 : index
    %12 = vector.load %arg9[%c0_18, %c0_19] : memref<1x256xf32, #tpu.memory_space<vmem>>, vector<1x256xf32>
    %c0_20 = arith.constant 0 : index
    %c0_21 = arith.constant 0 : index
    %13 = vector.load %arg10[%c0_20, %c0_21] : memref<1x1xf32, #tpu.memory_space<vmem>>, vector<1x1xf32>
    %14 = arith.truncf %1 : vector<4x256xf32> to vector<4x256xbf16>
    %cst = arith.constant dense<0.000000e+00> : vector<4x256xf32>
    %15 = tpu.matmul %14, %8, %cst {dimension_numbers = #tpu.dot_dimension_numbers<[1], [0], [0], [1], [0, 0, 1, 1], [], []>} : vector<4x256xbf16>, vector<256x256xbf16>, vector<4x256xf32> -> vector<4x256xf32>
    %16 = vector.broadcast %9 : vector<1x256xf32> to vector<4x256xf32>
    %17 = arith.addf %15, %16 : vector<4x256xf32>
    %cst_22 = arith.constant 0.000000e+00 : f32
    %18 = vector.broadcast %cst_22 : f32 to vector<4x256xf32>
    %19 = arith.maximumf %17, %18 : vector<4x256xf32>
    %20 = arith.truncf %19 : vector<4x256xf32> to vector<4x256xbf16>
    %21 = arith.truncf %5 : vector<4x256xf32> to vector<4x256xbf16>
    %22 = tpu.concatenate %20, %21 in 1 : vector<4x256xbf16>, vector<4x256xbf16> -> vector<4x512xbf16>
    %cst_23 = arith.constant dense<0.000000e+00> : vector<4x1024xf32>
    %23 = tpu.matmul %22, %10, %cst_23 {dimension_numbers = #tpu.dot_dimension_numbers<[1], [0], [0], [1], [0, 0, 1, 1], [], []>} : vector<4x512xbf16>, vector<512x1024xbf16>, vector<4x1024xf32> -> vector<4x1024xf32>
    %24 = vector.broadcast %11 : vector<1x1024xf32> to vector<4x1024xf32>
    %25 = arith.addf %23, %24 : vector<4x1024xf32>
    %26 = vector.extract_strided_slice %25 {offsets = [0, 0], sizes = [4, 256], strides = [1, 1]} : vector<4x1024xf32> to vector<4x256xf32>
    %27 = arith.negf %26 : vector<4x256xf32>
    %28 = math.exp %27 : vector<4x256xf32>
    %cst_24 = arith.constant 1.000000e+00 : f32
    %29 = vector.broadcast %cst_24 : f32 to vector<4x256xf32>
    %30 = arith.addf %29, %28 : vector<4x256xf32>
    %31 = arith.divf %29, %30 : vector<4x256xf32>
    %32 = vector.extract_strided_slice %25 {offsets = [0, 256], sizes = [4, 256], strides = [1, 1]} : vector<4x1024xf32> to vector<4x256xf32>
    %33 = arith.negf %32 : vector<4x256xf32>
    %34 = math.exp %33 : vector<4x256xf32>
    %cst_25 = arith.constant 1.000000e+00 : f32
    %35 = vector.broadcast %cst_25 : f32 to vector<4x256xf32>
    %36 = arith.addf %35, %34 : vector<4x256xf32>
    %37 = arith.divf %35, %36 : vector<4x256xf32>
    %38 = vector.extract_strided_slice %25 {offsets = [0, 512], sizes = [4, 256], strides = [1, 1]} : vector<4x1024xf32> to vector<4x256xf32>
    %39 = math.tanh %38 : vector<4x256xf32>
    %40 = vector.extract_strided_slice %25 {offsets = [0, 768], sizes = [4, 256], strides = [1, 1]} : vector<4x1024xf32> to vector<4x256xf32>
    %41 = arith.negf %40 : vector<4x256xf32>
    %42 = math.exp %41 : vector<4x256xf32>
    %cst_26 = arith.constant 1.000000e+00 : f32
    %43 = vector.broadcast %cst_26 : f32 to vector<4x256xf32>
    %44 = arith.addf %43, %42 : vector<4x256xf32>
    %45 = arith.divf %43, %44 : vector<4x256xf32>
    %46 = arith.mulf %37, %7 : vector<4x256xf32>
    %47 = arith.mulf %31, %39 : vector<4x256xf32>
    %48 = arith.addf %46, %47 : vector<4x256xf32>
    %49 = math.tanh %48 : vector<4x256xf32>
    %50 = arith.mulf %45, %49 : vector<4x256xf32>
    %cst_27 = arith.constant dense<0.000000e+00> : vector<4x256xf32>
    %51 = vector.multi_reduction <add>, %2, %cst_27 [0] : vector<4x4x256xf32> to vector<4x256xf32>
    %52 = arith.subf %51, %5 : vector<4x256xf32>
    %53 = arith.addf %50, %52 : vector<4x256xf32>
    %cst_28 = arith.constant 2.500000e-01 : f32
    %54 = vector.broadcast %cst_28 : f32 to vector<4x256xf32>
    %55 = arith.mulf %53, %54 : vector<4x256xf32>
    %56 = arith.mulf %55, %55 : vector<4x256xf32>
    %cst_29 = arith.constant dense<0.000000e+00> : vector<4xf32>
    %57 = vector.multi_reduction <add>, %56, %cst_29 [1] : vector<4x256xf32> to vector<4xf32>
    %58 = vector.shape_cast %57 : vector<4xf32> to vector<4x1xf32>
    %cst_30 = arith.constant 1.000000e-24 : f32
    %59 = vector.broadcast %cst_30 : f32 to vector<4x1xf32>
    %60 = arith.maximumf %58, %59 : vector<4x1xf32>
    %61 = math.rsqrt %60 : vector<4x1xf32>
    %62 = vector.broadcast %61 : vector<4x1xf32> to vector<4x256xf32>
    %63 = arith.mulf %55, %62 : vector<4x256xf32>
    %64 = vector.broadcast %12 : vector<1x256xf32> to vector<4x256xf32>
    %65 = arith.mulf %1, %64 : vector<4x256xf32>
    %cst_31 = arith.constant dense<0.000000e+00> : vector<4xf32>
    %66 = vector.multi_reduction <add>, %65, %cst_31 [1] : vector<4x256xf32> to vector<4xf32>
    %67 = vector.shape_cast %66 : vector<4xf32> to vector<4x1xf32>
    %68 = vector.broadcast %13 : vector<1x1xf32> to vector<4x1xf32>
    %69 = arith.addf %67, %68 : vector<4x1xf32>
    %c0_32 = arith.constant 0 : index
    %c0_33 = arith.constant 0 : index
    %70 = vector.load %arg12[%c0_32, %c0_33] : memref<4x256xf32, #tpu.memory_space<vmem>>, vector<4x256xf32>
    tpu.vector_store %arg12[%c0_32, %c0_33], %19 {strides = array<i32>} : memref<4x256xf32, #tpu.memory_space<vmem>>, vector<4x256xf32>,
    %c0_34 = arith.constant 0 : index
    %c0_35 = arith.constant 0 : index
    %71 = vector.load %arg13[%c0_34, %c0_35] : memref<4x256xf32, #tpu.memory_space<vmem>>, vector<4x256xf32>
    tpu.vector_store %arg13[%c0_34, %c0_35], %63 {strides = array<i32>} : memref<4x256xf32, #tpu.memory_space<vmem>>, vector<4x256xf32>,
    %c0_36 = arith.constant 0 : index
    %c0_37 = arith.constant 0 : index
    %72 = vector.load %arg11[%c0_36, %c0_37] : memref<4x1xf32, #tpu.memory_space<vmem>>, vector<4x1xf32>
    tpu.vector_store %arg11[%c0_36, %c0_37], %69 {strides = array<i32>} : memref<4x1xf32, #tpu.memory_space<vmem>>, vector<4x1xf32>,
    %c0_38 = arith.constant 0 : index
    %c0_39 = arith.constant 0 : index
    %c0_40 = arith.constant 0 : index
    %73 = vector.load %arg14[%c0_38, %c0_39, %c0_40] : memref<1x4x256xf32, #tpu.memory_space<vmem>>, vector<1x4x256xf32>
    %74 = vector.shape_cast %73 : vector<1x4x256xf32> to vector<4x256xf32>
    %75 = vector.shape_cast %50 : vector<4x256xf32> to vector<1x4x256xf32>
    tpu.vector_store %arg14[%c0_38, %c0_39, %c0_40], %75 {strides = array<i32>} : memref<1x4x256xf32, #tpu.memory_space<vmem>>, vector<1x4x256xf32>,
    %c0_41 = arith.constant 0 : index
    %c0_42 = arith.constant 0 : index
    %c0_43 = arith.constant 0 : index
    %76 = vector.load %arg15[%c0_41, %c0_42, %c0_43] : memref<1x4x256xf32, #tpu.memory_space<vmem>>, vector<1x4x256xf32>
    %77 = vector.shape_cast %76 : vector<1x4x256xf32> to vector<4x256xf32>
    %78 = vector.shape_cast %48 : vector<4x256xf32> to vector<1x4x256xf32>
    tpu.vector_store %arg15[%c0_41, %c0_42, %c0_43], %78 {strides = array<i32>} : memref<1x4x256xf32, #tpu.memory_space<vmem>>, vector<1x4x256xf32>,
    return
  }
  func.func @transform_0(%arg0: i32, %arg1: memref<1xi32, #tpu.memory_space<smem>>) -> (i32, i32) {
    %c0_i32 = arith.constant 0 : i32
    %c0_i32_0 = arith.constant 0 : i32
    %c0_i32_1 = arith.constant 0 : i32
    return %c0_i32, %c0_i32_0 : i32, i32
  }
  func.func @transform_1(%arg0: i32, %arg1: memref<1xi32, #tpu.memory_space<smem>>) -> (i32, i32, i32) {
    %c0_i32 = arith.constant 0 : i32
    %c0_i32_0 = arith.constant 0 : i32
    %c0_i32_1 = arith.constant 0 : i32
    %c0_i32_2 = arith.constant 0 : i32
    return %c0_i32, %c0_i32_0, %c0_i32_1 : i32, i32, i32
  }
  func.func @transform_2(%arg0: i32, %arg1: memref<1xi32, #tpu.memory_space<smem>>) -> (i32, i32, i32) {
    %c0 = arith.constant 0 : index
    %0 = memref.load %arg1[%c0] : memref<1xi32, #tpu.memory_space<smem>>
    %c0_i32 = arith.constant 0 : i32
    %c0_i32_0 = arith.constant 0 : i32
    %c0_i32_1 = arith.constant 0 : i32
    return %0, %c0_i32, %c0_i32_0 : i32, i32, i32
  }
  func.func @transform_3(%arg0: i32, %arg1: memref<1xi32, #tpu.memory_space<smem>>) -> (i32, i32) {
    %c0_i32 = arith.constant 0 : i32
    %c0_i32_0 = arith.constant 0 : i32
    %c0_i32_1 = arith.constant 0 : i32
    return %c0_i32, %c0_i32_0 : i32, i32
  }
  func.func @transform_4(%arg0: i32, %arg1: memref<1xi32, #tpu.memory_space<smem>>) -> (i32, i32) {
    %c0_i32 = arith.constant 0 : i32
    %c0_i32_0 = arith.constant 0 : i32
    %c0_i32_1 = arith.constant 0 : i32
    return %c0_i32, %c0_i32_0 : i32, i32
  }
  func.func @transform_5(%arg0: i32, %arg1: memref<1xi32, #tpu.memory_space<smem>>) -> (i32, i32) {
    %c0_i32 = arith.constant 0 : i32
    %c0_i32_0 = arith.constant 0 : i32
    %c0_i32_1 = arith.constant 0 : i32
    return %c0_i32, %c0_i32_0 : i32, i32
  }
  func.func @transform_6(%arg0: i32, %arg1: memref<1xi32, #tpu.memory_space<smem>>) -> (i32, i32) {
    %c0_i32 = arith.constant 0 : i32
    %c0_i32_0 = arith.constant 0 : i32
    %c0_i32_1 = arith.constant 0 : i32
    return %c0_i32, %c0_i32_0 : i32, i32
  }
  func.func @transform_7(%arg0: i32, %arg1: memref<1xi32, #tpu.memory_space<smem>>) -> (i32, i32) {
    %c0_i32 = arith.constant 0 : i32
    %c0_i32_0 = arith.constant 0 : i32
    %c0_i32_1 = arith.constant 0 : i32
    return %c0_i32, %c0_i32_0 : i32, i32
  }
  func.func @transform_8(%arg0: i32, %arg1: memref<1xi32, #tpu.memory_space<smem>>) -> (i32, i32) {
    %c0_i32 = arith.constant 0 : i32
    %c0_i32_0 = arith.constant 0 : i32
    %c0_i32_1 = arith.constant 0 : i32
    return %c0_i32, %c0_i32_0 : i32, i32
  }
  func.func @transform_9(%arg0: i32, %arg1: memref<1xi32, #tpu.memory_space<smem>>) -> (i32, i32) {
    %c0_i32 = arith.constant 0 : i32
    %c0_i32_0 = arith.constant 0 : i32
    %c0_i32_1 = arith.constant 0 : i32
    return %c0_i32, %c0_i32_0 : i32, i32
  }
  func.func @transform_10(%arg0: i32, %arg1: memref<1xi32, #tpu.memory_space<smem>>) -> (i32, i32) {
    %c0_i32 = arith.constant 0 : i32
    %c0_i32_0 = arith.constant 0 : i32
    %c0_i32_1 = arith.constant 0 : i32
    return %c0_i32, %c0_i32_0 : i32, i32
  }
  func.func @transform_11(%arg0: i32, %arg1: memref<1xi32, #tpu.memory_space<smem>>) -> (i32, i32) {
    %c0_i32 = arith.constant 0 : i32
    %c0_i32_0 = arith.constant 0 : i32
    %c0_i32_1 = arith.constant 0 : i32
    return %c0_i32, %c0_i32_0 : i32, i32
  }
  func.func @transform_12(%arg0: i32, %arg1: memref<1xi32, #tpu.memory_space<smem>>) -> (i32, i32, i32) {
    %c0 = arith.constant 0 : index
    %0 = memref.load %arg1[%c0] : memref<1xi32, #tpu.memory_space<smem>>
    %c0_i32 = arith.constant 0 : i32
    %c0_i32_0 = arith.constant 0 : i32
    %c0_i32_1 = arith.constant 0 : i32
    return %0, %c0_i32, %c0_i32_0 : i32, i32, i32
  }
  func.func @transform_13(%arg0: i32, %arg1: memref<1xi32, #tpu.memory_space<smem>>) -> (i32, i32, i32) {
    %c0 = arith.constant 0 : index
    %0 = memref.load %arg1[%c0] : memref<1xi32, #tpu.memory_space<smem>>
    %c0_i32 = arith.constant 0 : i32
    %c0_i32_0 = arith.constant 0 : i32
    %c0_i32_1 = arith.constant 0 : i32
    return %0, %c0_i32, %c0_i32_0 : i32, i32, i32
  }
}

</mosaic_0001>

<bundles_post_ra>
// kernel: tpu_custom_call.1
= control target key start
LH: loop header
LB: loop body
LE: loop exit
PB: predicated region body
PF: predicated region fallthrough
CT: control target
= control target key end

     0   :  { %s3292_s0 = inlined_call_operand.<no memory space> [shape: s32[1], index: 0, kind: input, shape index: {}]   ;;  %s3293_s1 = inlined_call_operand.vmem [shape: f32[4,256], index: 1, kind: input, shape index: {}]   ;;  %s3294_s2 = inlined_call_operand.vmem [shape: f32[4,4,256], index: 2, kind: input, shape index: {}, may-alias: {2,13}]   ;;  %s3295_s3 = inlined_call_operand.vmem [shape: f32[4,4,256], index: 3, kind: input, shape index: {}, may-alias: {3,14}]   ;;  %s3296_s4 = inlined_call_operand.hbm [shape: bf16[256,256], index: 4, kind: input, shape index: {}]   ;;  %s3297_s5 = inlined_call_operand.vmem [shape: f32[1,256], index: 5, kind: input, shape index: {}]   ;;  %s3298_s6 = inlined_call_operand.hbm [shape: bf16[512,1024], index: 6, kind: input, shape index: {}]   ;;  %s3299_s7 = inlined_call_operand.vmem [shape: f32[1,1024], index: 7, kind: input, shape index: {}]   ;;  %s3300_s8 = inlined_call_operand.vmem [shape: f32[1,256], index: 8, kind: input, shape index: {}]   ;;  %s3301_s9 = inlined_call_operand.<no memory space> [shape: f32[1,1], index: 9, kind: input, shape index: {}]   ;;  %s3302_s10 = inlined_call_operand.vmem [shape: f32[4,1], index: 10, kind: output, shape index: {0}]   ;;  %s3303_s11 = inlined_call_operand.hbm [shape: f32[4,256], index: 11, kind: output, shape index: {1}]   ;;  %s3304_s12 = inlined_call_operand.hbm [shape: f32[4,256], index: 12, kind: output, shape index: {2}]   ;;  %s3305_s13 = inlined_call_operand.vmem [shape: f32[4,4,256], index: 13, kind: output, shape index: {3}, may-alias: {2,13}]   ;;  %s3306_s14 = inlined_call_operand.vmem [shape: f32[4,4,256], index: 14, kind: output, shape index: {4}, may-alias: {3,14}]  }
   0x1   :  { %v21_v0 = vstv %s3301_s9 }
   0x2   :  { %22 = vst [vmem:[#allocation4] sm:$0x1] %v21_v0 }
   0x3   :  { %23 = vsyncpa [#allocation6], 0 }
   0x4   :  { %24 = vsyncpa [#allocation9], 0 }
   0x5   :  { %25 = vsyncpa [#allocation7], 0 }
   0x6   :  { %26 = vsyncpa [#allocation12], 0  ;;  %s3025_s15 = smov [#allocation5]  }
   0x7   :  { %s45_s16 = sshll.u32 %s3025_s15, 4  ;;  %s46_s16 = int_to_ptr.vmem [resolvable:$true] %s45_s16 }
   0x8   :  { %s2945_s17 = scalar_lea.vmem %s46_s16, 4096  ;;  %p2950_p1 = scmp.lt.s32.totalorder %s46_s16, %s46_s16 }
   0x9   :  { %p2946_p0 = scmp.ne.s32.totalorder %s46_s16, %s2945_s17  ;;  %p2951_p2 = scmp.lt.s32.totalorder %s2945_s17, %s2945_s17 }
   0xb   :  { %p2952_p3 = por %p2951_p2, %p2950_p1 }
   0xd   :  { %p2953_p4 = pnand %p2952_p3, %p2946_p0 }
   0xf   :  { %2956 = shalt.err (!%p2953_p4)
}
  0x10   :  { %s3026_s18 = smov 128   ;;  %s3027_s19 = smov 8  }
  0x11   :  { %51 = dma.hbm_to_vmem [thread:$0]  %s3296_s4, 4096, %s46_s16, [#allocation6], %s3026_s18, %s3026_s18, %s3027_s19  }
  0x12   :  { %s3028_s9 = smov [#allocation8]  }
  0x13   :  { %s59_s22 = sshll.u32 %s3028_s9, 4  ;;  %s60_s22 = int_to_ptr.vmem [resolvable:$true] %s59_s22 }
  0x14   :  { %s2965_s23 = scalar_lea.vmem %s60_s22, 32768  ;;  %p2970_p6 = scmp.lt.s32.totalorder %s60_s22, %s60_s22 }
  0x15   :  { %p2966_p5 = scmp.ne.s32.totalorder %s60_s22, %s2965_s23  ;;  %p2971_p7 = scmp.lt.s32.totalorder %s2965_s23, %s2965_s23 }
  0x17   :  { %p2972_p8 = por %p2971_p7, %p2970_p6 }
  0x19   :  { %p2973_p9 = pnand %p2972_p8, %p2966_p5 }
  0x1b   :  { %2976 = shalt.err (!%p2973_p9)
}
  0x1c   :  { %s3029_s24 = smov 512   ;;  %s3030_s25 = smov 32  }
  0x1d   :  { %65 = dma.hbm_to_vmem [thread:$0]  %s3298_s6, 32768, %s60_s22, [#allocation9], %s3029_s24, %s3029_s24, %s3030_s25  }
  0x1e   :  { %3017 = dma.done.wait [#allocation6], 4096  }
  0x1f   :  { %3018 = vsyncadd [#allocation6], 4294963200 }
  0x20   :  { %3019 = dma.done.wait [#allocation9], 32768  }
  0x21   :  { %3020 = vsyncadd [#allocation9], 4294934528  ;;  %v2846_v1 = vld [vmem:[#allocation5 + $0x74] ss:$8 sps:$4 sm:$0xff]   ;;  %v2848_v2 = vld [vmem:[#allocation5 + $0x70] ss:$8 sps:$4 sm:$0xff]  }
  0x22   :  { %596 = vmatprep.subr.bf16.mxu0 %v2846_v1  ;;  %v2849_v3 = vld [vmem:[#allocation5 + $0x64] ss:$8 sps:$4 sm:$0xff]   ;;  %v2851_v4 = vld [vmem:[#allocation5 + $0x60] ss:$8 sps:$4 sm:$0xff]   ;;  %v2852_v5 = vld [vmem:[#allocation5 + $0x54] ss:$8 sps:$4 sm:$0xff]  }
  0x23   :  { %597 = vmatpush1.bf16.msra.mxu0 %v2848_v2  ;;  %v2854_v6 = vld [vmem:[#allocation5 + $0x50] ss:$8 sps:$4 sm:$0xff]   ;;  %v2855_v7 = vld [vmem:[#allocation5 + $0x44] ss:$8 sps:$4 sm:$0xff]   ;;  %v2857_v8 = vld [vmem:[#allocation5 + $0x40] ss:$8 sps:$4 sm:$0xff]  }
  0x24   :  { %598 = vmatprep.subr.bf16.mxu0 %v2849_v3  ;;  %v2858_v9 = vld [vmem:[#allocation5 + $0x34] ss:$8 sps:$4 sm:$0xff]   ;;  %v2860_v10 = vld [vmem:[#allocation5 + $0x30] ss:$8 sps:$4 sm:$0xff]   ;;  %v2861_v11 = vld [vmem:[#allocation5 + $0x24] ss:$8 sps:$4 sm:$0xff]  }
  0x25   :  { %v2863_v12 = vld [vmem:[#allocation5 + $0x20] ss:$8 sps:$4 sm:$0xff]   ;;  %v2864_v13 = vld [vmem:[#allocation5 + $0x14] ss:$8 sps:$4 sm:$0xff]   ;;  %v2866_v18 = vld [vmem:[#allocation5 + $0x10] ss:$8 sps:$4 sm:$0xff]  }
  0x26   :  { %v3120_v14 = vld [vmem:[%s3293_s1] sm:$0xff]  ;;  %v2872_v35 = vld [vmem:[#allocation5 + $0xf0] ss:$8 sps:$4 sm:$0xff]   ;;  %s2837_s30 = sshll.u32 %s3292_s0, 3  ;;  %p97_p10 = scmp.lt.s32.totalorder %s3292_s0, 3  ;;  %vm2358_vm0 = vcmask 1043456  }
  0x27   :  { %599 = vmatpush1.bf16.msra.mxu0 %v2851_v4  ;;  %v421_v15 = vcombine.high %v3120_v14, %v3120_v14  ;;  %v217_v16 = vld [vmem:[#allocation8 + $0x1c0] sm:$0xff]  ;;  %v2870_v31 = vld [vmem:[#allocation5 + $0xf4] ss:$8 sps:$4 sm:$0xff]   ;;  %v2878_v47 = vld [vmem:[#allocation5 + $0xd0] ss:$8 sps:$4 sm:$0xff]   ;;  %s3132_s17 = scalar_lea.vmem %s3294_s2, %s2837_s30 }
  0x28   :  { %600 = vmatprep.subr.bf16.mxu0 %v2852_v5  ;;  %v221_v17 = vld [vmem:[#allocation8 + $0x1e0] sm:$0xff]  ;;  %v2876_v43 = vld [vmem:[#allocation5 + $0xd4] ss:$8 sps:$4 sm:$0xff]   ;;  %v2884_v59 = vld [vmem:[#allocation5 + $0xb0] ss:$8 sps:$4 sm:$0xff]   ;;  %s3308_s0 = smov (!%p97_p10, %s3292_s0), 3 }
  0x29   :  { %v2628_v19 = vcombine.high %v217_v16, %v221_v17  ;;  %v2627_v20 = vcombine.low %v217_v16, %v221_v17  ;;  %v209_v21 = vld [vmem:[#allocation8 + $0x180] sm:$0xff]  ;;  %v424_v23 = vpack.c.bf16 %v421_v15, %v421_v15  ;;  %v2882_v55 = vld [vmem:[#allocation5 + $0xb4] ss:$8 sps:$4 sm:$0xff]   ;;  %s3229_s23 = sshll.u32 %s3308_s0, 3 }
  0x2a   :  { %v2867_v22 = vld [vmem:[#allocation5 + $0x4] ss:$8 sps:$4 sm:$0xff]   ;;  %v2869_v29 = vld [vmem:[#allocation5] ss:$8 sps:$4 sm:$0xff]   ;;  %v2888_v3 = vld [vmem:[#allocation5 + $0x94] ss:$8 sps:$4 sm:$0xff]   ;;  %s101_s26 = scalar_lea.vmem %s3295_s3, %s3229_s23  ;;  %s115_s4 = scalar_lea.vmem %s3306_s14, %s3229_s23 }
  0x2b   :  { %601 = vmatpush1.bf16.msra.mxu0 %v2854_v6  ;;  %v213_v24 = vld [vmem:[#allocation8 + $0x1a0] sm:$0xff]  ;;  %1967 = vmatprep.subr.bf16.mxu1 %v2628_v19 }
  0x2c   :  { %602 = vmatprep.subr.bf16.mxu0 %v2855_v7  ;;  %v2620_v25 = vcombine.high %v209_v21, %v213_v24  ;;  %v201_v26 = vld [vmem:[#allocation8 + $0x140] sm:$0xff]  ;;  %628 = vmatprep.mubr.bf16.mxu0 %v424_v23  ;;  %v2619_v28 = vcombine.low %v209_v21, %v213_v24  ;;  %v2890_v7 = vld [vmem:[#allocation5 + $0x90] ss:$8 sps:$4 sm:$0xff]   ;;  %v423_v23 = vpack.c.bf16 %v3120_v14, %v3120_v14 }
  0x2d   :  { %v205_v27 = vld [vmem:[#allocation8 + $0x160] sm:$0xff]  ;;  %1968 = vmatpush1.bf16.msra.mxu1 %v2627_v20 }
  0x2e   :  { %1969 = vmatprep.subr.bf16.mxu1 %v2620_v25  ;;  %v2612_v30 = vcombine.high %v201_v26, %v205_v27  ;;  %v193_v32 = vld [vmem:[#allocation8 + $0x100] sm:$0xff]  ;;  %v2611_v34 = vcombine.low %v201_v26, %v205_v27 }
  0x2f   :  { %603 = vmatpush1.bf16.msra.mxu0 %v2857_v8  ;;  %v197_v33 = vld [vmem:[#allocation8 + $0x120] sm:$0xff] }
  0x30   :  { %604 = vmatprep.subr.bf16.mxu0 %v2858_v9  ;;  %v2604_v36 = vcombine.high %v193_v32, %v197_v33  ;;  %v2873_v37 = vld [vmem:[#allocation5 + $0xe4] ss:$8 sps:$4 sm:$0xff]   ;;  %v2603_v40 = vcombine.low %v193_v32, %v197_v33  ;;  %v2875_v41 = vld [vmem:[#allocation5 + $0xe0] ss:$8 sps:$4 sm:$0xff]  }
  0x31   :  { %1970 = vmatpush1.bf16.msra.mxu1 %v2619_v28  ;;  %v185_v38 = vld [vmem:[#allocation8 + $0xc0] sm:$0xff] }
  0x32   :  { %1971 = vmatprep.subr.bf16.mxu1 %v2612_v30  ;;  %v189_v39 = vld [vmem:[#allocation8 + $0xe0] sm:$0xff] }
  0x33   :  { %605 = vmatpush1.bf16.msra.mxu0 %v2860_v10  ;;  %v2596_v42 = vcombine.high %v185_v38, %v189_v39  ;;  %v177_v44 = vld [vmem:[#allocation8 + $0x80] sm:$0xff]  ;;  %v2595_v46 = vcombine.low %v185_v38, %v189_v39 }
  0x34   :  { %606 = vmatprep.subr.bf16.mxu0 %v2861_v11  ;;  %v181_v45 = vld [vmem:[#allocation8 + $0xa0] sm:$0xff] }
  0x35   :  { %1972 = vmatpush1.bf16.msra.mxu1 %v2611_v34  ;;  %v2588_v48 = vcombine.high %v177_v44, %v181_v45  ;;  %v2879_v49 = vld [vmem:[#allocation5 + $0xc4] ss:$8 sps:$4 sm:$0xff]   ;;  %v2587_v52 = vcombine.low %v177_v44, %v181_v45  ;;  %v2881_v53 = vld [vmem:[#allocation5 + $0xc0] ss:$8 sps:$4 sm:$0xff]  }
  0x36   :  { %1973 = vmatprep.subr.bf16.mxu1 %v2604_v36  ;;  %v169_v50 = vld [vmem:[#allocation8 + $0x40] sm:$0xff] }
  0x37   :  { %607 = vmatpush1.bf16.msra.mxu0 %v2863_v12  ;;  %v173_v51 = vld [vmem:[#allocation8 + $0x60] sm:$0xff] }
  0x38   :  { %608 = vmatprep.subr.bf16.mxu0 %v2864_v13  ;;  %v2580_v54 = vcombine.high %v169_v50, %v173_v51  ;;  %v161_v56 = vld [vmem:[#allocation8] sm:$0xff]  ;;  %v2579_v58 = vcombine.low %v169_v50, %v173_v51 }
  0x39   :  { %1974 = vmatpush1.bf16.msra.mxu1 %v2603_v40  ;;  %v165_v57 = vld [vmem:[#allocation8 + $0x20] sm:$0xff] }
  0x3a   :  { %1975 = vmatprep.subr.bf16.mxu1 %v2596_v42  ;;  %v2572_v60 = vcombine.high %v161_v56, %v165_v57  ;;  %v2885_v61 = vld [vmem:[#allocation5 + $0xa4] ss:$8 sps:$4 sm:$0xff]   ;;  %v2571_v0 = vcombine.low %v161_v56, %v165_v57  ;;  %v2887_v1 = vld [vmem:[#allocation5 + $0xa0] ss:$8 sps:$4 sm:$0xff]  }
  0x3b   :  { %609 = vmatpush1.bf16.msra.mxu0 %v2866_v18  ;;  %v281_v62 = vld [vmem:[#allocation8 + $0x3c0] sm:$0xff] }
  0x3c   :  { %610 = vmatprep.subr.bf16.mxu0 %v2867_v22  ;;  %v285_v63 = vld [vmem:[#allocation8 + $0x3e0] sm:$0xff] }
  0x3d   :  { %1976 = vmatpush1.bf16.msra.mxu1 %v2595_v46  ;;  %v2692_v2 = vcombine.high %v281_v62, %v285_v63  ;;  %v273_v4 = vld [vmem:[#allocation8 + $0x380] sm:$0xff]  ;;  %v2691_v6 = vcombine.low %v281_v62, %v285_v63 }
  0x3e   :  { %1977 = vmatprep.subr.bf16.mxu1 %v2588_v48  ;;  %v277_v5 = vld [vmem:[#allocation8 + $0x3a0] sm:$0xff] }
  0x3f   :  { %611 = vmatpush1.bf16.msra.mxu0 %v2869_v29  ;;  %v2684_v8 = vcombine.high %v273_v4, %v277_v5  ;;  %v2891_v9 = vld [vmem:[#allocation5 + $0x84] ss:$8 sps:$4 sm:$0xff]   ;;  %v2683_v15 = vcombine.low %v273_v4, %v277_v5  ;;  %v2893_v16 = vld [vmem:[#allocation5 + $0x80] ss:$8 sps:$4 sm:$0xff]  }
  0x40   :  { %612 = vmatprep.subr.bf16.mxu0 %v2870_v31  ;;  %v265_v10 = vld [vmem:[#allocation8 + $0x340] sm:$0xff] }
  0x41   :  { %1978 = vmatpush1.bf16.msra.mxu1 %v2587_v52  ;;  %v269_v11 = vld [vmem:[#allocation8 + $0x360] sm:$0xff] }
  0x42   :  { %1979 = vmatprep.subr.bf16.mxu1 %v2580_v54  ;;  %v345_v12 = vld [vmem:[#allocation8 + $0x5c0] sm:$0xff]  ;;  %v2676_v17 = vcombine.high %v265_v10, %v269_v11  ;;  %v2675_v24 = vcombine.low %v265_v10, %v269_v11 }
  0x43   :  { %613 = vmatpush2.bf16.msra.mxu0 %v2872_v35  ;;  %v349_v13 = vld [vmem:[#allocation8 + $0x5e0] sm:$0xff] }
  0x44   :  { %614 = vmatprep.subr.bf16.mxu0 %v2873_v37  ;;  %v2756_v18 = vcombine.high %v345_v12, %v349_v13  ;;  %v257_v19 = vld [vmem:[#allocation8 + $0x300] sm:$0xff]  ;;  %v2755_v25 = vcombine.low %v345_v12, %v349_v13 }
  0x45   :  { %1980 = vmatpush1.bf16.msra.mxu1 %v2579_v58  ;;  %v261_v20 = vld [vmem:[#allocation8 + $0x320] sm:$0xff] }
  0x46   :  { %1981 = vmatprep.subr.bf16.mxu1 %v2572_v60  ;;  %v337_v21 = vld [vmem:[#allocation8 + $0x580] sm:$0xff]  ;;  %v2668_v26 = vcombine.high %v257_v19, %v261_v20  ;;  %v2667_v32 = vcombine.low %v257_v19, %v261_v20 }
  0x47   :  { %615 = vmatpush2.bf16.msra.mxu0 %v2875_v41  ;;  %v341_v22 = vld [vmem:[#allocation8 + $0x5a0] sm:$0xff] }
  0x48   :  { %616 = vmatprep.subr.bf16.mxu0 %v2876_v43  ;;  %v2748_v27 = vcombine.high %v337_v21, %v341_v22  ;;  %v249_v28 = vld [vmem:[#allocation8 + $0x2c0] sm:$0xff]  ;;  %v2747_v33 = vcombine.low %v337_v21, %v341_v22 }
  0x49   :  { %1982 = vmatpush1.bf16.msra.mxu1 %v2571_v0  ;;  %v253_v29 = vld [vmem:[#allocation8 + $0x2e0] sm:$0xff] }
  0x4a   :  { %1983 = vmatprep.subr.bf16.mxu1 %v2692_v2  ;;  %v329_v30 = vld [vmem:[#allocation8 + $0x540] sm:$0xff]  ;;  %v2660_v34 = vcombine.high %v249_v28, %v253_v29  ;;  %v2659_v39 = vcombine.low %v249_v28, %v253_v29 }
  0x4b   :  { %617 = vmatpush2.bf16.msra.mxu0 %v2878_v47  ;;  %v333_v31 = vld [vmem:[#allocation8 + $0x560] sm:$0xff] }
  0x4c   :  { %618 = vmatprep.subr.bf16.mxu0 %v2879_v49  ;;  %v2740_v14 = vcombine.high %v329_v30, %v333_v31  ;;  %v241_v35 = vld [vmem:[#allocation8 + $0x280] sm:$0xff]  ;;  %v2739_v40 = vcombine.low %v329_v30, %v333_v31 }
  0x4d   :  { %1984 = vmatpush2.bf16.msra.mxu1 %v2691_v6  ;;  %v245_v36 = vld [vmem:[#allocation8 + $0x2a0] sm:$0xff] }
  0x4e   :  { %1985 = vmatprep.subr.bf16.mxu1 %v2684_v8  ;;  %v321_v37 = vld [vmem:[#allocation8 + $0x500] sm:$0xff]  ;;  %v2652_v41 = vcombine.high %v241_v35, %v245_v36  ;;  %v2651_v45 = vcombine.low %v241_v35, %v245_v36 }
  0x4f   :  { %619 = vmatpush2.bf16.msra.mxu0 %v2881_v53  ;;  %v325_v38 = vld [vmem:[#allocation8 + $0x520] sm:$0xff] }
  0x50   :  { %620 = vmatprep.subr.bf16.mxu0 %v2882_v55  ;;  %v2732_v42 = vcombine.high %v321_v37, %v325_v38  ;;  %v313_v43 = vld [vmem:[#allocation8 + $0x4c0] sm:$0xff]  ;;  %v2731_v46 = vcombine.low %v321_v37, %v325_v38  ;;  %v346_v37 = vld [vmem:[#allocation8 + $0x5c8] sm:$0xff] }
  0x51   :  { %1986 = vmatpush2.bf16.msra.mxu1 %v2683_v15  ;;  %v317_v44 = vld [vmem:[#allocation8 + $0x4e0] sm:$0xff] }
  0x52   :  { %1987 = vmatprep.subr.bf16.mxu1 %v2676_v17  ;;  %v2724_v47 = vcombine.high %v313_v43, %v317_v44  ;;  %v305_v48 = vld [vmem:[#allocation8 + $0x480] sm:$0xff]  ;;  %v2723_v50 = vcombine.low %v313_v43, %v317_v44 }
  0x53   :  { %621 = vmatpush2.bf16.msra.mxu0 %v2884_v59  ;;  %v309_v49 = vld [vmem:[#allocation8 + $0x4a0] sm:$0xff] }
  0x54   :  { %622 = vmatprep.subr.bf16.mxu0 %v2885_v61  ;;  %v2716_v51 = vcombine.high %v305_v48, %v309_v49  ;;  %v297_v52 = vld [vmem:[#allocation8 + $0x440] sm:$0xff]  ;;  %v2715_v54 = vcombine.low %v305_v48, %v309_v49  ;;  %v342_v49 = vld [vmem:[#allocation8 + $0x5a8] sm:$0xff] }
  0x55   :  { %1988 = vmatpush2.bf16.msra.mxu1 %v2675_v24  ;;  %v301_v53 = vld [vmem:[#allocation8 + $0x460] sm:$0xff] }
  0x56   :  { %1989 = vmatprep.subr.bf16.mxu1 %v2668_v26  ;;  %v2708_v55 = vcombine.high %v297_v52, %v301_v53  ;;  %v289_v56 = vld [vmem:[#allocation8 + $0x400] sm:$0xff]  ;;  %v2707_v58 = vcombine.low %v297_v52, %v301_v53  ;;  %v330_v53 = vld [vmem:[#allocation8 + $0x548] sm:$0xff] }
  0x57   :  { %623 = vmatpush2.bf16.msra.mxu0 %v2887_v1  ;;  %v293_v57 = vld [vmem:[#allocation8 + $0x420] sm:$0xff] }
  0x58   :  { %624 = vmatprep.subr.bf16.mxu0 %v2888_v3  ;;  %v2700_v59 = vcombine.high %v289_v56, %v293_v57  ;;  %v409_v60 = vld [vmem:[#allocation8 + $0x7c0] sm:$0xff]  ;;  %v2699_v62 = vcombine.low %v289_v56, %v293_v57  ;;  %v322_v57 = vld [vmem:[#allocation8 + $0x508] sm:$0xff] }
  0x59   :  { %1990 = vmatpush2.bf16.msra.mxu1 %v2667_v32  ;;  %v413_v61 = vld [vmem:[#allocation8 + $0x7e0] sm:$0xff] }
  0x5a   :  { %1991 = vmatprep.subr.bf16.mxu1 %v2660_v34  ;;  %v2820_v63 = vcombine.high %v409_v60, %v413_v61  ;;  %v401_v0 = vld [vmem:[#allocation8 + $0x780] sm:$0xff]  ;;  %v2819_v2 = vcombine.low %v409_v60, %v413_v61  ;;  %v314_v61 = vld [vmem:[#allocation8 + $0x4c8] sm:$0xff] }
  0x5b   :  { %625 = vmatpush2.bf16.msra.mxu0 %v2890_v7  ;;  %v405_v1 = vld [vmem:[#allocation8 + $0x7a0] sm:$0xff] }
  0x5c   :  { %626 = vmatprep.subr.bf16.mxu0 %v2891_v9  ;;  %v2812_v3 = vcombine.high %v401_v0, %v405_v1  ;;  %v393_v4 = vld [vmem:[#allocation8 + $0x740] sm:$0xff]  ;;  %v2811_v6 = vcombine.low %v401_v0, %v405_v1  ;;  %v306_v1 = vld [vmem:[#allocation8 + $0x488] sm:$0xff] }
  0x5d   :  { %1992 = vmatpush2.bf16.msra.mxu1 %v2659_v39  ;;  %v397_v5 = vld [vmem:[#allocation8 + $0x760] sm:$0xff] }
  0x5e   :  { %1993 = vmatprep.subr.bf16.mxu1 %v2652_v41  ;;  %v2804_v7 = vcombine.high %v393_v4, %v397_v5  ;;  %v385_v8 = vld [vmem:[#allocation8 + $0x700] sm:$0xff]  ;;  %v2803_v10 = vcombine.low %v393_v4, %v397_v5  ;;  %v298_v5 = vld [vmem:[#allocation8 + $0x448] sm:$0xff] }
  0x5f   :  { %627 = vmatpush2.bf16.msra.mxu0 %v2893_v16  ;;  %v389_v9 = vld [vmem:[#allocation8 + $0x720] sm:$0xff] }
  0x60   :  { %2008 = vmatprep.subr.bf16.mxu0 %v2756_v18  ;;  %v2796_v11 = vcombine.high %v385_v8, %v389_v9  ;;  %v377_v12 = vld [vmem:[#allocation8 + $0x6c0] sm:$0xff]  ;;  %v2795_v15 = vcombine.low %v385_v8, %v389_v9  ;;  %v290_v9 = vld [vmem:[#allocation8 + $0x408] sm:$0xff] }
  0x61   :  { %1994 = vmatpush2.bf16.msra.mxu1 %v2651_v45  ;;  %v381_v13 = vld [vmem:[#allocation8 + $0x6e0] sm:$0xff]  ;;  %v3144_v45 = vld [vmem:[#allocation8 + $0x1c8] sm:$0xff] }
  0x62   :  { %629 = vmatmul.mubr.bf16.vlgmr.msra.gmra.mxu0 %v423_v23  ;;  %v2788_v16 = vcombine.high %v377_v12, %v381_v13  ;;  %v369_v17 = vld [vmem:[#allocation8 + $0x680] sm:$0xff]  ;;  %v2787_v19 = vcombine.low %v377_v12, %v381_v13  ;;  %v410_v13 = vld [vmem:[#allocation8 + $0x7c8] sm:$0xff] }
  0x63   :  { %2009 = vmatpush1.bf16.msra.mxu0 %v2755_v25  ;;  %v373_v18 = vld [vmem:[#allocation8 + $0x6a0] sm:$0xff] }
  0x64   :  { %2010 = vmatprep.subr.bf16.mxu0 %v2748_v27  ;;  %v2780_v20 = vcombine.high %v369_v17, %v373_v18  ;;  %v361_v21 = vld [vmem:[#allocation8 + $0x640] sm:$0xff]  ;;  %v2779_v23 = vcombine.low %v369_v17, %v373_v18  ;;  %v402_v18 = vld [vmem:[#allocation8 + $0x788] sm:$0xff] }
  0x65   :  { %v365_v22 = vld [vmem:[#allocation8 + $0x660] sm:$0xff] }
  0x66   :  { %v2772_v24 = vcombine.high %v361_v21, %v365_v22  ;;  %v2771_v25 = vcombine.low %v361_v21, %v365_v22  ;;  %v233_v26 = vld [vmem:[#allocation8 + $0x240] sm:$0xff]  ;;  %v394_v22 = vld [vmem:[#allocation8 + $0x748] sm:$0xff] }
  0x67   :  { %2011 = vmatpush1.bf16.msra.mxu0 %v2747_v33  ;;  %v237_v27 = vld [vmem:[#allocation8 + $0x260] sm:$0xff] }
  0x68   :  { %2012 = vmatprep.subr.bf16.mxu0 %v2740_v14  ;;  %v353_v28 = vld [vmem:[#allocation8 + $0x600] sm:$0xff]  ;;  %v2644_v29 = vcombine.high %v233_v26, %v237_v27  ;;  %v2643_v33 = vcombine.low %v233_v26, %v237_v27  ;;  %v386_v26 = vld [vmem:[#allocation8 + $0x708] sm:$0xff] }
  0x69   :  { %v357_v30 = vld [vmem:[#allocation8 + $0x620] sm:$0xff]  ;;  %v390_v27 = vld [vmem:[#allocation8 + $0x728] sm:$0xff] }
  0x6a   :  { %v2763_v31 = vcombine.low %v353_v28, %v357_v30  ;;  %v2764_v32 = vcombine.high %v353_v28, %v357_v30  ;;  %v126_v34 = vld [vmem:[%s3132_s17] sm:$0xff]  ;;  %1995 = vmatprep.subr.bf16.mxu1 %v2644_v29  ;;  %v2797_v28 = vcombine.low %v386_v26, %v390_v27  ;;  %v2798_v29 = vcombine.high %v386_v26, %v390_v27  ;;  %v378_v30 = vld [vmem:[#allocation8 + $0x6c8] sm:$0xff] }
  0x6b   :  { %2013 = vmatpush1.bf16.msra.mxu0 %v2739_v40  ;;  %v3135_v14 = vcombine.high %v126_v34, %v126_v34  ;;  %1996 = vmatpush2.bf16.msra.mxu1 %v2643_v33  ;;  %v225_v35 = vld [vmem:[#allocation8 + $0x200] sm:$0xff]  ;;  %v350_v40 = vld [vmem:[#allocation8 + $0x5e8] sm:$0xff]  ;;  %v3141_v44 = vpack.c.bf16 %v126_v34, %v126_v34 }
  0x6c   :  { %2014 = vmatprep.subr.bf16.mxu0 %v2732_v42  ;;  %v229_v36 = vld [vmem:[#allocation8 + $0x220] sm:$0xff]  ;;  %v2757_v41 = vcombine.low %v346_v37, %v350_v40  ;;  %v2758_v42 = vcombine.high %v346_v37, %v350_v40  ;;  %v370_v34 = vld [vmem:[#allocation8 + $0x688] sm:$0xff] }
  0x6d   :  { %v2636_v38 = vcombine.high %v225_v35, %v229_v36  ;;  %v3139_v39 = vpack.c.bf16 %v3135_v14, %v3135_v14  ;;  %v2635_v43 = vcombine.low %v225_v35, %v229_v36  ;;  %v374_v35 = vld [vmem:[#allocation8 + $0x6a8] sm:$0xff] }
  0x6e   :  { %v2781_v36 = vcombine.low %v370_v34, %v374_v35  ;;  %v2782_v37 = vcombine.high %v370_v34, %v374_v35  ;;  %v366_v40 = vld [vmem:[#allocation8 + $0x668] sm:$0xff]  ;;  %v426_v34 = vlaneseq }
  0x6f   :  { %2015 = vmatpush1.bf16.msra.mxu0 %v2731_v46  ;;  %1997 = vmatprep.subr.bf16.mxu1 %v2636_v38  ;;  %v3146_v46 = vld [vmem:[#allocation8 + $0x1e8] sm:$0xff] }
  0x70   :  { %2016 = vmatprep.subr.bf16.mxu0 %v2724_v47  ;;  %2040 = vmatprep.mubr.bf16.mxu0 %v3139_v39  ;;  %v338_v47 = vld [vmem:[#allocation8 + $0x588] sm:$0xff]  ;;  %v2630_v48 = vcombine.high %v3144_v45, %v3146_v46 }
  0x71   :  { %1998 = vmatpush2.bf16.msra.mxu1 %v2635_v43  ;;  %v2750_v52 = vcombine.high %v338_v47, %v342_v49  ;;  %v362_v38 = vld [vmem:[#allocation8 + $0x648] sm:$0xff] }
  0x72   :  { %2049 = vmatprep.subr.bf16.mxu1 %v2630_v48  ;;  %v354_v43 = vld [vmem:[#allocation8 + $0x608] sm:$0xff] }
  0x73   :  { %2017 = vmatpush1.bf16.msra.mxu0 %v2723_v50  ;;  %v2629_v50 = vcombine.low %v3144_v45, %v3146_v46  ;;  %v328_v46 = vld [vmem:[#allocation8 + $0x538] sm:$0xff] }
  0x74   :  { %2018 = vmatprep.subr.bf16.mxu0 %v2716_v51  ;;  %v2749_v51 = vcombine.low %v338_v47, %v342_v49  ;;  %v358_v47 = vld [vmem:[#allocation8 + $0x628] sm:$0xff] }
  0x75   :  { %v2765_v48 = vcombine.low %v354_v43, %v358_v47  ;;  %v2766_v49 = vcombine.high %v354_v43, %v358_v47  ;;  %v371_v43 = vld [vmem:[#allocation8 + $0x690] sm:$0xff] }
  0x76   :  { %v375_v47 = vld [vmem:[#allocation8 + $0x6b0] sm:$0xff] }
  0x77   :  { %2019 = vmatpush1.bf16.msra.mxu0 %v2715_v54  ;;  %v334_v54 = vld [vmem:[#allocation8 + $0x568] sm:$0xff] }
  0x78   :  { %2020 = vmatprep.subr.bf16.mxu0 %v2708_v55  ;;  %v2741_v55 = vcombine.low %v330_v53, %v334_v54  ;;  %v2742_v56 = vcombine.high %v330_v53, %v334_v54 }
  0x7b   :  { %2021 = vmatpush1.bf16.msra.mxu0 %v2707_v58  ;;  %v326_v58 = vld [vmem:[#allocation8 + $0x528] sm:$0xff] }
  0x7c   :  { %2022 = vmatprep.subr.bf16.mxu0 %v2700_v59  ;;  %v2733_v59 = vcombine.low %v322_v57, %v326_v58  ;;  %v2734_v60 = vcombine.high %v322_v57, %v326_v58 }
  0x7f   :  { %2023 = vmatpush1.bf16.msra.mxu0 %v2699_v62  ;;  %v318_v62 = vld [vmem:[#allocation8 + $0x4e8] sm:$0xff] }
  0x80   :  { %2024 = vmatprep.subr.bf16.mxu0 %v2820_v63  ;;  %v2725_v63 = vcombine.low %v314_v61, %v318_v62  ;;  %v2726_v0 = vcombine.high %v314_v61, %v318_v62 }
  0x83   :  { %2025 = vmatpush2.bf16.msra.mxu0 %v2819_v2  ;;  %v310_v2 = vld [vmem:[#allocation8 + $0x4a8] sm:$0xff] }
  0x84   :  { %2026 = vmatprep.subr.bf16.mxu0 %v2812_v3  ;;  %v2717_v3 = vcombine.low %v306_v1, %v310_v2  ;;  %v2718_v4 = vcombine.high %v306_v1, %v310_v2 }
  0x87   :  { %2027 = vmatpush2.bf16.msra.mxu0 %v2811_v6  ;;  %v302_v6 = vld [vmem:[#allocation8 + $0x468] sm:$0xff] }
  0x88   :  { %2028 = vmatprep.subr.bf16.mxu0 %v2804_v7  ;;  %v2709_v7 = vcombine.low %v298_v5, %v302_v6  ;;  %v2710_v8 = vcombine.high %v298_v5, %v302_v6 }
  0x8b   :  { %2029 = vmatpush2.bf16.msra.mxu0 %v2803_v10  ;;  %v294_v10 = vld [vmem:[#allocation8 + $0x428] sm:$0xff] }
  0x8c   :  { %2030 = vmatprep.subr.bf16.mxu0 %v2796_v11  ;;  %v2701_v11 = vcombine.low %v290_v9, %v294_v10  ;;  %v2702_v12 = vcombine.high %v290_v9, %v294_v10 }
  0x8f   :  { %2031 = vmatpush2.bf16.msra.mxu0 %v2795_v15  ;;  %v414_v15 = vld [vmem:[#allocation8 + $0x7e8] sm:$0xff] }
  0x90   :  { %2032 = vmatprep.subr.bf16.mxu0 %v2788_v16  ;;  %v2821_v16 = vcombine.low %v410_v13, %v414_v15  ;;  %v2822_v17 = vcombine.high %v410_v13, %v414_v15 }
  0x93   :  { %2033 = vmatpush2.bf16.msra.mxu0 %v2787_v19  ;;  %v406_v19 = vld [vmem:[#allocation8 + $0x7a8] sm:$0xff] }
  0x94   :  { %2034 = vmatprep.subr.bf16.mxu0 %v2780_v20  ;;  %v2813_v20 = vcombine.low %v402_v18, %v406_v19  ;;  %v2814_v21 = vcombine.high %v402_v18, %v406_v19 }
  0x97   :  { %2035 = vmatpush2.bf16.msra.mxu0 %v2779_v23  ;;  %v398_v23 = vld [vmem:[#allocation8 + $0x768] sm:$0xff] }
  0x98   :  { %2036 = vmatprep.subr.bf16.mxu0 %v2772_v24  ;;  %v2805_v24 = vcombine.low %v394_v22, %v398_v23 }
  0x9b   :  { %2037 = vmatpush2.bf16.msra.mxu0 %v2771_v25  ;;  %v2806_v25 = vcombine.high %v394_v22, %v398_v23 }
  0x9c   :  { %2038 = vmatprep.subr.bf16.mxu0 %v2764_v32 }
  0x9f   :  { %2039 = vmatpush2.bf16.msra.mxu0 %v2763_v31  ;;  %v382_v31 = vld [vmem:[#allocation8 + $0x6e8] sm:$0xff] }
  0xa0   :  { %2090 = vmatprep.subr.bf16.mxu0 %v2758_v42  ;;  %v2789_v32 = vcombine.low %v378_v30, %v382_v31  ;;  %v2790_v33 = vcombine.high %v378_v30, %v382_v31  ;;  %v2774_v42 = vcombine.high %v362_v38, %v366_v40 }
  0xa2   :  { %2041 = vmatmul.mubr.bf16.vlgmr.msra.gmra.mxu0 %v3141_v44 }
  0xa3   :  { %2091 = vmatpush1.bf16.msra.mxu0 %v2757_v41  ;;  %2122 = vmatprep.mubr.bf16.mxu0 %v3139_v39  ;;  %v2773_v41 = vcombine.low %v362_v38, %v366_v40  ;;  %v383_v38 = vld [vmem:[#allocation8 + $0x6f0] sm:$0xff]  ;;  %v3156_v40 = vshrl.u32 %v426_v34, 7  ;;  %v190_v34 = vld [vmem:[#allocation8 + $0xe8] sm:$0xff] }
  0xa4   :  { %2092 = vmatprep.subr.bf16.mxu0 %v2750_v52  ;;  %v351_v52 = vld [vmem:[#allocation8 + $0x5f0] sm:$0xff] }
  0xa7   :  { %2093 = vmatpush1.bf16.msra.mxu0 %v2749_v51  ;;  %v347_v51 = vld [vmem:[#allocation8 + $0x5d0] sm:$0xff] }
  0xa8   :  { %2094 = vmatprep.subr.bf16.mxu0 %v2742_v56  ;;  %v2759_v53 = vcombine.low %v347_v51, %v351_v52  ;;  %v2760_v54 = vcombine.high %v347_v51, %v351_v52  ;;  %v343_v56 = vld [vmem:[#allocation8 + $0x5b0] sm:$0xff]  ;;  %v2784_v51 = vcombine.high %v371_v43, %v375_v47  ;;  %v160_v52 = vld [vmem:[%s3297_s5] sm:$0x3] }
  0xab   :  { %2095 = vmatpush1.bf16.msra.mxu0 %v2741_v55  ;;  %v339_v55 = vld [vmem:[#allocation8 + $0x590] sm:$0xff] }
  0xac   :  { %2096 = vmatprep.subr.bf16.mxu0 %v2734_v60  ;;  %v2751_v57 = vcombine.low %v339_v55, %v343_v56  ;;  %v2752_v58 = vcombine.high %v339_v55, %v343_v56  ;;  %v335_v60 = vld [vmem:[#allocation8 + $0x570] sm:$0xff] }
  0xad   :  { %v367_v55 = vld [vmem:[#allocation8 + $0x670] sm:$0xff] }
  0xaf   :  { %2097 = vmatpush1.bf16.msra.mxu0 %v2733_v59  ;;  %v331_v59 = vld [vmem:[#allocation8 + $0x550] sm:$0xff] }
  0xb0   :  { %2098 = vmatprep.subr.bf16.mxu0 %v2726_v0  ;;  %v2743_v61 = vcombine.low %v331_v59, %v335_v60  ;;  %v2744_v62 = vcombine.high %v331_v59, %v335_v60  ;;  %v327_v0 = vld [vmem:[#allocation8 + $0x530] sm:$0xff] }
  0xb1   :  { %v355_v60 = vld [vmem:[#allocation8 + $0x610] sm:$0xff] }
  0xb3   :  { %2099 = vmatpush1.bf16.msra.mxu0 %v2725_v63  ;;  %v323_v63 = vld [vmem:[#allocation8 + $0x510] sm:$0xff] }
  0xb4   :  { %2100 = vmatprep.subr.bf16.mxu0 %v2718_v4  ;;  %v2735_v1 = vcombine.low %v323_v63, %v327_v0  ;;  %v2736_v2 = vcombine.high %v323_v63, %v327_v0  ;;  %v319_v4 = vld [vmem:[#allocation8 + $0x4f0] sm:$0xff] }
  0xb7   :  { %2101 = vmatpush1.bf16.msra.mxu0 %v2717_v3  ;;  %v315_v3 = vld [vmem:[#allocation8 + $0x4d0] sm:$0xff] }
  0xb8   :  { %2102 = vmatprep.subr.bf16.mxu0 %v2710_v8  ;;  %v2727_v5 = vcombine.low %v315_v3, %v319_v4  ;;  %v2728_v6 = vcombine.high %v315_v3, %v319_v4  ;;  %v311_v8 = vld [vmem:[#allocation8 + $0x4b0] sm:$0xff]  ;;  %v348_v4 = vld [vmem:[#allocation8 + $0x5d8] sm:$0xff] }
  0xbb   :  { %2103 = vmatpush1.bf16.msra.mxu0 %v2709_v7  ;;  %v307_v7 = vld [vmem:[#allocation8 + $0x490] sm:$0xff] }
  0xbc   :  { %2104 = vmatprep.subr.bf16.mxu0 %v2702_v12  ;;  %v2719_v9 = vcombine.low %v307_v7, %v311_v8  ;;  %v2720_v10 = vcombine.high %v307_v7, %v311_v8  ;;  %v303_v12 = vld [vmem:[#allocation8 + $0x470] sm:$0xff]  ;;  %v352_v7 = vld [vmem:[#allocation8 + $0x5f8] sm:$0xff] }
  0xbf   :  { %2105 = vmatpush1.bf16.msra.mxu0 %v2701_v11  ;;  %v299_v11 = vld [vmem:[#allocation8 + $0x450] sm:$0xff] }
  0xc0   :  { %2106 = vmatprep.subr.bf16.mxu0 %v2822_v17  ;;  %v2711_v13 = vcombine.low %v299_v11, %v303_v12  ;;  %v2712_v15 = vcombine.high %v299_v11, %v303_v12  ;;  %v295_v17 = vld [vmem:[#allocation8 + $0x430] sm:$0xff]  ;;  %v2761_v11 = vcombine.low %v348_v4, %v352_v7  ;;  %v2762_v12 = vcombine.high %v348_v4, %v352_v7 }
  0xc3   :  { %2107 = vmatpush2.bf16.msra.mxu0 %v2821_v16  ;;  %v291_v16 = vld [vmem:[#allocation8 + $0x410] sm:$0xff] }
  0xc4   :  { %2108 = vmatprep.subr.bf16.mxu0 %v2814_v21  ;;  %v2703_v18 = vcombine.low %v291_v16, %v295_v17  ;;  %v2704_v19 = vcombine.high %v291_v16, %v295_v17  ;;  %v415_v21 = vld [vmem:[#allocation8 + $0x7f0] sm:$0xff]  ;;  %v340_v17 = vld [vmem:[#allocation8 + $0x598] sm:$0xff] }
  0xc7   :  { %2109 = vmatpush2.bf16.msra.mxu0 %v2813_v20  ;;  %v411_v20 = vld [vmem:[#allocation8 + $0x7d0] sm:$0xff] }
  0xc8   :  { %2110 = vmatprep.subr.bf16.mxu0 %v2806_v25  ;;  %v2823_v22 = vcombine.low %v411_v20, %v415_v21  ;;  %v2824_v23 = vcombine.high %v411_v20, %v415_v21  ;;  %v407_v25 = vld [vmem:[#allocation8 + $0x7b0] sm:$0xff]  ;;  %v344_v20 = vld [vmem:[#allocation8 + $0x5b8] sm:$0xff]  ;;  %v202_v21 = vld [vmem:[#allocation8 + $0x148] sm:$0xff] }
  0xcb   :  { %2111 = vmatpush2.bf16.msra.mxu0 %v2805_v24  ;;  %v403_v24 = vld [vmem:[#allocation8 + $0x790] sm:$0xff] }
  0xcc   :  { %2112 = vmatprep.subr.bf16.mxu0 %v2798_v29  ;;  %v2815_v26 = vcombine.low %v403_v24, %v407_v25  ;;  %v2816_v27 = vcombine.high %v403_v24, %v407_v25  ;;  %v399_v29 = vld [vmem:[#allocation8 + $0x770] sm:$0xff]  ;;  %v2754_v24 = vcombine.high %v340_v17, %v344_v20 }
  0xcf   :  { %2113 = vmatpush2.bf16.msra.mxu0 %v2797_v28  ;;  %v395_v28 = vld [vmem:[#allocation8 + $0x750] sm:$0xff] }
  0xd0   :  { %2114 = vmatprep.subr.bf16.mxu0 %v2790_v33  ;;  %v2807_v30 = vcombine.low %v395_v28, %v399_v29  ;;  %v2808_v31 = vcombine.high %v395_v28, %v399_v29  ;;  %v391_v33 = vld [vmem:[#allocation8 + $0x730] sm:$0xff]  ;;  %v194_v28 = vld [vmem:[#allocation8 + $0x108] sm:$0xff] }
  0xd1   :  { %v198_v29 = vld [vmem:[#allocation8 + $0x128] sm:$0xff] }
  0xd2   :  { %v2606_v45 = vcombine.high %v194_v28, %v198_v29 }
  0xd3   :  { %2115 = vmatpush2.bf16.msra.mxu0 %v2789_v32  ;;  %v387_v32 = vld [vmem:[#allocation8 + $0x710] sm:$0xff] }
  0xd4   :  { %2116 = vmatprep.subr.bf16.mxu0 %v2782_v37  ;;  %v2799_v35 = vcombine.low %v387_v32, %v391_v33  ;;  %v379_v37 = vld [vmem:[#allocation8 + $0x6d0] sm:$0xff] }
  0xd7   :  { %2117 = vmatpush2.bf16.msra.mxu0 %v2781_v36  ;;  %v2800_v36 = vcombine.high %v387_v32, %v391_v33  ;;  %v324_v33 = vld [vmem:[#allocation8 + $0x518] sm:$0xff] }
  0xd8   :  { %2118 = vmatprep.subr.bf16.mxu0 %v2774_v42  ;;  %v2792_v42 = vcombine.high %v379_v37, %v383_v38 }
  0xdb   :  { %2119 = vmatpush2.bf16.msra.mxu0 %v2773_v41  ;;  %v2791_v41 = vcombine.low %v379_v37, %v383_v38  ;;  %v2605_v37 = vcombine.low %v194_v28, %v198_v29  ;;  %v316_v38 = vld [vmem:[#allocation8 + $0x4d8] sm:$0xff]  ;;  %v270_v28 = vld [vmem:[#allocation8 + $0x368] sm:$0xff] }
  0xdc   :  { %2120 = vmatprep.subr.bf16.mxu0 %v2766_v49  ;;  %v2783_v49 = vcombine.low %v371_v43, %v375_v47  ;;  %v178_v43 = vld [vmem:[#allocation8 + $0x88] sm:$0xff] }
  0xdd   :  { %v182_v47 = vld [vmem:[#allocation8 + $0xa8] sm:$0xff] }
  0xdf   :  { %2121 = vmatpush2.bf16.msra.mxu0 %v2765_v48  ;;  %v3159_v48 = vsub.s32 0, %v3156_v40 }
  0xe0   :  { %2172 = vmatprep.subr.bf16.mxu0 %v2760_v54  ;;  %v363_v54 = vld [vmem:[#allocation8 + $0x650] sm:$0xff] }
  0xe1   :  { %v429_v56 = vrot.slane %v160_v52, %v3159_v48 }
  0xe2   :  { %2123 = vmatmul.mubr.bf16.vlgmr.msra.gmra.mxu0 %v3141_v44 }
  0xe3   :  { %2173 = vmatpush1.bf16.msra.mxu0 %v2759_v53  ;;  %2204 = vmatprep.mubr.bf16.mxu0 %v3139_v39  ;;  %v3165_v53 = vsub.s32 1, %v3156_v40 }
  0xe4   :  { %2174 = vmatprep.subr.bf16.mxu0 %v2752_v58  ;;  %v2776_v58 = vcombine.high %v363_v54, %v367_v55 }
  0xe5   :  { %v433_v59 = vrot.slane %v160_v52, %v3165_v53 }
  0xe7   :  { %2175 = vmatpush1.bf16.msra.mxu0 %v2751_v57  ;;  %v2775_v57 = vcombine.low %v363_v54, %v367_v55  ;;  %v308_v54 = vld [vmem:[#allocation8 + $0x498] sm:$0xff]  ;;  %v2590_v55 = vcombine.high %v178_v43, %v182_v47 }
  0xe8   :  { %2176 = vmatprep.subr.bf16.mxu0 %v2744_v62  ;;  %v359_v62 = vld [vmem:[#allocation8 + $0x630] sm:$0xff] }
  0xe9   :  { %v2767_v0 = vcombine.low %v355_v60, %v359_v62 }
  0xeb   :  { %2177 = vmatpush1.bf16.msra.mxu0 %v2743_v61 }
  0xec   :  { %2178 = vmatprep.subr.bf16.mxu0 %v2736_v2 }
  0xef   :  { %2179 = vmatpush1.bf16.msra.mxu0 %v2735_v1  ;;  %v2768_v1 = vcombine.high %v355_v60, %v359_v62  ;;  %v300_v62 = vld [vmem:[#allocation8 + $0x458] sm:$0xff] }
  0xf0   :  { %2180 = vmatprep.subr.bf16.mxu0 %v2728_v6 }
  0xf3   :  { %2181 = vmatpush1.bf16.msra.mxu0 %v2727_v5 }
  0xf4   :  { %2182 = vmatprep.subr.bf16.mxu0 %v2720_v10  ;;  %v214_v10 = vld [vmem:[#allocation8 + $0x1a8] sm:$0xff] }
  0xf7   :  { %2183 = vmatpush1.bf16.msra.mxu0 %v2719_v9  ;;  %v210_v9 = vld [vmem:[#allocation8 + $0x188] sm:$0xff] }
  0xf8   :  { %2184 = vmatprep.subr.bf16.mxu0 %v2712_v15  ;;  %v2621_v25 = vcombine.low %v210_v9, %v214_v10 }
  0xfb   :  { %2185 = vmatpush1.bf16.msra.mxu0 %v2711_v13 }
  0xfc   :  { %2186 = vmatprep.subr.bf16.mxu0 %v2704_v19  ;;  %v2622_v19 = vcombine.high %v210_v9, %v214_v10  ;;  %v282_v9 = vld [vmem:[#allocation8 + $0x3c8] sm:$0xff] }
  0xfd   :  { %v286_v10 = vld [vmem:[#allocation8 + $0x3e8] sm:$0xff] }
  0xff   :  { %2187 = vmatpush1.bf16.msra.mxu0 %v2703_v18 }
 0x100   :  { %2188 = vmatprep.subr.bf16.mxu0 %v2824_v23  ;;  %v2753_v23 = vcombine.low %v340_v17, %v344_v20  ;;  %v2694_v17 = vcombine.high %v282_v9, %v286_v10  ;;  %v274_v20 = vld [vmem:[#allocation8 + $0x388] sm:$0xff] }
 0x103   :  { %2189 = vmatpush2.bf16.msra.mxu0 %v2823_v22  ;;  %v206_v22 = vld [vmem:[#allocation8 + $0x168] sm:$0xff] }
 0x104   :  { %2190 = vmatprep.subr.bf16.mxu0 %v2816_v27  ;;  %v2614_v27 = vcombine.high %v202_v21, %v206_v22  ;;  %v2613_v32 = vcombine.low %v202_v21, %v206_v22  ;;  %v278_v21 = vld [vmem:[#allocation8 + $0x3a8] sm:$0xff] }
 0x107   :  { %2191 = vmatpush2.bf16.msra.mxu0 %v2815_v26  ;;  %v332_v26 = vld [vmem:[#allocation8 + $0x558] sm:$0xff] }
 0x108   :  { %2192 = vmatprep.subr.bf16.mxu0 %v2808_v31 }
 0x10b   :  { %2193 = vmatpush2.bf16.msra.mxu0 %v2807_v30 }
 0x10c   :  { %2194 = vmatprep.subr.bf16.mxu0 %v2800_v36  ;;  %v2738_v36 = vcombine.high %v324_v33, %v328_v46 }
 0x10f   :  { %2195 = vmatpush2.bf16.msra.mxu0 %v2799_v35  ;;  %v2737_v35 = vcombine.low %v324_v33, %v328_v46  ;;  %v258_v46 = vld [vmem:[#allocation8 + $0x308] sm:$0xff] }
 0x110   :  { %2196 = vmatprep.subr.bf16.mxu0 %v2792_v42  ;;  %v320_v42 = vld [vmem:[#allocation8 + $0x4f8] sm:$0xff] }
 0x113   :  { %2197 = vmatpush2.bf16.msra.mxu0 %v2791_v41 }
 0x114   :  { %2198 = vmatprep.subr.bf16.mxu0 %v2784_v51  ;;  %v2730_v51 = vcombine.high %v316_v38, %v320_v42 }
 0x117   :  { %2199 = vmatpush2.bf16.msra.mxu0 %v2783_v49  ;;  %v2729_v49 = vcombine.low %v316_v38, %v320_v42  ;;  %v250_v42 = vld [vmem:[#allocation8 + $0x2c8] sm:$0xff] }
 0x118   :  { %2200 = vmatprep.subr.bf16.mxu0 %v2776_v58  ;;  %v174_v58 = vld [vmem:[#allocation8 + $0x68] sm:$0xff] }
 0x11b   :  { %2201 = vmatpush2.bf16.msra.mxu0 %v2775_v57  ;;  %v170_v57 = vld [vmem:[#allocation8 + $0x48] sm:$0xff] }
 0x11c   :  { %2202 = vmatprep.subr.bf16.mxu0 %v2768_v1  ;;  %v162_v1 = vld [vmem:[#allocation8 + $0x8] sm:$0xff] }
 0x11f   :  { %2203 = vmatpush2.bf16.msra.mxu0 %v2767_v0  ;;  %v304_v0 = vld [vmem:[#allocation8 + $0x478] sm:$0xff] }
 0x120   :  { %2254 = vmatprep.subr.bf16.mxu0 %v2762_v12  ;;  %v2714_v4 = vcombine.high %v300_v62, %v304_v0 }
 0x122   :  { %v630_v61 = vpop.f32.mrf.mxu0  ;;  %2205 = vmatmul.mubr.bf16.vlgmr.msra.gmra.mxu0 %v3141_v44 }
 0x123   :  { %v631_v63 = vadd.f32 %v630_v61, %v429_v56  ;;  %2255 = vmatpush1.bf16.msra.mxu0 %v2761_v11  ;;  %2286 = vmatprep.mubr.bf16.mxu0 %v3139_v39  ;;  %v336_v39 = vld [vmem:[#allocation8 + $0x578] sm:$0xff]  ;;  %v2589_v61 = vcombine.low %v178_v43, %v182_v47  ;;  %v254_v43 = vld [vmem:[#allocation8 + $0x2e8] sm:$0xff] }
 0x124   :  { %v632_v2 = vpop.f32.mrf.mxu0  ;;  %2256 = vmatprep.subr.bf16.mxu0 %v2754_v24  ;;  %v2745_v30 = vcombine.low %v332_v26, %v336_v39  ;;  %v2746_v31 = vcombine.high %v332_v26, %v336_v39  ;;  %v312_v56 = vld [vmem:[#allocation8 + $0x4b8] sm:$0xff]  ;;  %v2693_v24 = vcombine.low %v282_v9, %v286_v10  ;;  %v2686_v26 = vcombine.high %v274_v20, %v278_v21  ;;  %v266_v39 = vld [vmem:[#allocation8 + $0x348] sm:$0xff] }
 0x125   :  { %v633_v3 = vadd.f32 %v632_v2, %v433_v59  ;;  %v637_v5 = vmax.f32 %v631_v63, 0.0  ;;  %v2721_v59 = vcombine.low %v308_v54, %v312_v56  ;;  %v2722_v60 = vcombine.high %v308_v54, %v312_v56  ;;  %v166_v2 = vld [vmem:[#allocation8 + $0x28] sm:$0xff] }
 0x126   :  { %v634_v6 = vpop.f32.mrf.mxu0  ;;  %v2582_v63 = vcombine.high %v170_v57, %v174_v58  ;;  %v2574_v7 = vcombine.high %v162_v1, %v166_v2  ;;  %v2678_v33 = vcombine.high %v266_v39, %v270_v28  ;;  %v2662_v54 = vcombine.high %v250_v42, %v254_v43  ;;  %v242_v56 = vld [vmem:[#allocation8 + $0x288] sm:$0xff] }
 0x127   :  { %v638_v8 = vmax.f32 %v633_v3, 0.0  ;;  %v3172_v18 = vpack.c.bf16 %v637_v5, %v637_v5  ;;  %2257 = vmatpush1.bf16.msra.mxu0 %v2753_v23  ;;  %v2713_v3 = vcombine.low %v300_v62, %v304_v0  ;;  %v292_v6 = vld [vmem:[#allocation8 + $0x418] sm:$0xff]  ;;  %v234_v0 = vld [vmem:[#allocation8 + $0x248] sm:$0xff] }
 0x128   :  { %v635_v13 = vpop.f32.mrf.mxu0  ;;  %2258 = vmatprep.subr.bf16.mxu0 %v2746_v31  ;;  %v2685_v31 = vcombine.low %v274_v20, %v278_v21  ;;  %v230_v9 = vld [vmem:[#allocation8 + $0x228] sm:$0xff]  ;;  %v223_v20 = vld [vmem:[#allocation8 + $0x1f0] sm:$0xff] }
 0x129   :  { %v3169_v15 = vpack.c.bf16 %v638_v8, %v638_v8  ;;  %v2419_v16 = vcombine.low %v637_v5, %v638_v8  ;;  %v2581_v5 = vcombine.low %v170_v57, %v174_v58  ;;  %v296_v8 = vld [vmem:[#allocation8 + $0x438] sm:$0xff]  ;;  %v2573_v13 = vcombine.low %v162_v1, %v166_v2  ;;  %v246_v57 = vld [vmem:[#allocation8 + $0x2a8] sm:$0xff] }
 0x12a   :  { %v2705_v11 = vcombine.low %v292_v6, %v296_v8  ;;  %v2706_v12 = vcombine.high %v292_v6, %v296_v8  ;;  %v2654_v62 = vcombine.high %v242_v56, %v246_v57  ;;  %v238_v1 = vld [vmem:[#allocation8 + $0x268] sm:$0xff] }
 0x12b   :  { %2421 = vst [vmem:[#allocation10] sm:$0xff] %v2419_v16  ;;  %1999 = vmatprep.mubr.bf16.mxu1 %v3169_v15  ;;  %2259 = vmatpush1.bf16.msra.mxu0 %v2745_v30  ;;  %v412_v16 = vld [vmem:[#allocation8 + $0x7d8] sm:$0xff]  ;;  %v2646_v6 = vcombine.high %v234_v0, %v238_v1  ;;  %v226_v8 = vld [vmem:[#allocation8 + $0x208] sm:$0xff] }
 0x12c   :  { %2000 = vmatmul.mubr.bf16.vlgmr.msra.gmra.mxu1 %v3172_v18  ;;  %2260 = vmatprep.subr.bf16.mxu0 %v2738_v36  ;;  %v2677_v36 = vcombine.low %v266_v39, %v270_v28 }
 0x12d   :  { %2050 = vmatpush1.bf16.msra.mxu1 %v2629_v50  ;;  %2081 = vmatprep.mubr.bf16.mxu1 %v3169_v15  ;;  %v186_v50 = vld [vmem:[#allocation8 + $0xc8] sm:$0xff] }
 0x12e   :  { %2051 = vmatprep.subr.bf16.mxu1 %v2622_v19  ;;  %v2598_v41 = vcombine.high %v186_v50, %v190_v34  ;;  %v2597_v52 = vcombine.low %v186_v50, %v190_v34  ;;  %v416_v19 = vld [vmem:[#allocation8 + $0x7f8] sm:$0xff]  ;;  %v262_v50 = vld [vmem:[#allocation8 + $0x328] sm:$0xff] }
 0x12f   :  { %2261 = vmatpush1.bf16.msra.mxu0 %v2737_v35  ;;  %v2825_v22 = vcombine.low %v412_v16, %v416_v19  ;;  %v2826_v23 = vcombine.high %v412_v16, %v416_v19  ;;  %v2670_v38 = vcombine.high %v258_v46, %v262_v50  ;;  %v2638_v16 = vcombine.high %v226_v8, %v230_v9  ;;  %v219_v19 = vld [vmem:[#allocation8 + $0x1d0] sm:$0xff] }
 0x130   :  { %2262 = vmatprep.subr.bf16.mxu0 %v2730_v51  ;;  %v2669_v51 = vcombine.low %v258_v46, %v262_v50  ;;  %v195_v46 = vld [vmem:[#allocation8 + $0x110] sm:$0xff] }
 0x131   :  { %2052 = vmatpush1.bf16.msra.mxu1 %v2621_v25  ;;  %v404_v25 = vld [vmem:[#allocation8 + $0x798] sm:$0xff]  ;;  %v199_v50 = vld [vmem:[#allocation8 + $0x130] sm:$0xff] }
 0x132   :  { %2053 = vmatprep.subr.bf16.mxu1 %v2614_v27  ;;  %v408_v27 = vld [vmem:[#allocation8 + $0x7b8] sm:$0xff] }
 0x133   :  { %2263 = vmatpush1.bf16.msra.mxu0 %v2729_v49  ;;  %v2817_v29 = vcombine.low %v404_v25, %v408_v27  ;;  %v2818_v30 = vcombine.high %v404_v25, %v408_v27  ;;  %v211_v25 = vld [vmem:[#allocation8 + $0x190] sm:$0xff]  ;;  %v2631_v27 = vcombine.low %v219_v19, %v223_v20 }
 0x134   :  { %2264 = vmatprep.subr.bf16.mxu0 %v2722_v60  ;;  %v2661_v60 = vcombine.low %v250_v42, %v254_v43  ;;  %v179_v42 = vld [vmem:[#allocation8 + $0x90] sm:$0xff] }
 0x135   :  { %2054 = vmatpush1.bf16.msra.mxu1 %v2613_v32  ;;  %v396_v32 = vld [vmem:[#allocation8 + $0x758] sm:$0xff]  ;;  %v183_v43 = vld [vmem:[#allocation8 + $0xb0] sm:$0xff] }
 0x136   :  { %2055 = vmatprep.subr.bf16.mxu1 %v2606_v45  ;;  %v400_v45 = vld [vmem:[#allocation8 + $0x778] sm:$0xff] }
 0x137   :  { %2265 = vmatpush1.bf16.msra.mxu0 %v2721_v59  ;;  %v2809_v34 = vcombine.low %v396_v32, %v400_v45  ;;  %v2810_v35 = vcombine.high %v396_v32, %v400_v45 }
 0x138   :  { %2266 = vmatprep.subr.bf16.mxu0 %v2714_v4  ;;  %v2653_v4 = vcombine.low %v242_v56, %v246_v57  ;;  %v163_v56 = vld [vmem:[#allocation8 + $0x10] sm:$0xff] }
 0x139   :  { %2056 = vmatpush1.bf16.msra.mxu1 %v2605_v37  ;;  %v388_v37 = vld [vmem:[#allocation8 + $0x718] sm:$0xff]  ;;  %v167_v57 = vld [vmem:[#allocation8 + $0x30] sm:$0xff] }
 0x13a   :  { %2057 = vmatprep.subr.bf16.mxu1 %v2598_v41  ;;  %v392_v41 = vld [vmem:[#allocation8 + $0x738] sm:$0xff] }
 0x13b   :  { %2267 = vmatpush1.bf16.msra.mxu0 %v2713_v3  ;;  %v2801_v47 = vcombine.low %v388_v37, %v392_v41  ;;  %v2802_v49 = vcombine.high %v388_v37, %v392_v41  ;;  %v191_v37 = vld [vmem:[#allocation8 + $0xf0] sm:$0xff] }
 0x13c   :  { %2268 = vmatprep.subr.bf16.mxu0 %v2706_v12  ;;  %v2645_v12 = vcombine.low %v234_v0, %v238_v1  ;;  %v275_v0 = vld [vmem:[#allocation8 + $0x390] sm:$0xff] }
 0x13d   :  { %2058 = vmatpush1.bf16.msra.mxu1 %v2597_v52  ;;  %v380_v52 = vld [vmem:[#allocation8 + $0x6d8] sm:$0xff]  ;;  %v279_v1 = vld [vmem:[#allocation8 + $0x3b0] sm:$0xff] }
 0x13e   :  { %2059 = vmatprep.subr.bf16.mxu1 %v2590_v55  ;;  %v384_v55 = vld [vmem:[#allocation8 + $0x6f8] sm:$0xff] }
 0x13f   :  { %2269 = vmatpush1.bf16.msra.mxu0 %v2705_v11  ;;  %v2793_v58 = vcombine.low %v380_v52, %v384_v55  ;;  %v2794_v59 = vcombine.high %v380_v52, %v384_v55  ;;  %v175_v52 = vld [vmem:[#allocation8 + $0x70] sm:$0xff] }
 0x140   :  { %2270 = vmatprep.subr.bf16.mxu0 %v2826_v23  ;;  %v2637_v23 = vcombine.low %v226_v8, %v230_v9  ;;  %v259_v8 = vld [vmem:[#allocation8 + $0x310] sm:$0xff] }
 0x141   :  { %2060 = vmatpush1.bf16.msra.mxu1 %v2589_v61  ;;  %v372_v61 = vld [vmem:[#allocation8 + $0x698] sm:$0xff]  ;;  %v263_v9 = vld [vmem:[#allocation8 + $0x330] sm:$0xff] }
 0x142   :  { %2061 = vmatprep.subr.bf16.mxu1 %v2582_v63  ;;  %v376_v63 = vld [vmem:[#allocation8 + $0x6b8] sm:$0xff] }
 0x143   :  { %2271 = vmatpush2.bf16.msra.mxu0 %v2825_v22  ;;  %v2785_v2 = vcombine.low %v372_v61, %v376_v63  ;;  %v2786_v3 = vcombine.high %v372_v61, %v376_v63  ;;  %v287_v61 = vld [vmem:[#allocation8 + $0x3f0] sm:$0xff] }
 0x144   :  { %2272 = vmatprep.subr.bf16.mxu0 %v2818_v30  ;;  %v207_v30 = vld [vmem:[#allocation8 + $0x170] sm:$0xff] }
 0x145   :  { %2062 = vmatpush1.bf16.msra.mxu1 %v2581_v5  ;;  %v364_v5 = vld [vmem:[#allocation8 + $0x658] sm:$0xff] }
 0x146   :  { %2063 = vmatprep.subr.bf16.mxu1 %v2574_v7  ;;  %v368_v7 = vld [vmem:[#allocation8 + $0x678] sm:$0xff] }
 0x147   :  { %2273 = vmatpush2.bf16.msra.mxu0 %v2817_v29  ;;  %v2777_v10 = vcombine.low %v364_v5, %v368_v7  ;;  %v2778_v11 = vcombine.high %v364_v5, %v368_v7  ;;  %v203_v29 = vld [vmem:[#allocation8 + $0x150] sm:$0xff] }
 0x148   :  { %2274 = vmatprep.subr.bf16.mxu0 %v2810_v35  ;;  %v2616_v45 = vcombine.high %v203_v29, %v207_v30  ;;  %v2615_v35 = vcombine.low %v203_v29, %v207_v30  ;;  %v271_v5 = vld [vmem:[#allocation8 + $0x370] sm:$0xff] }
 0x149   :  { %2064 = vmatpush1.bf16.msra.mxu1 %v2573_v13  ;;  %v356_v13 = vld [vmem:[#allocation8 + $0x618] sm:$0xff] }
 0x14a   :  { %2065 = vmatprep.subr.bf16.mxu1 %v2694_v17  ;;  %v360_v17 = vld [vmem:[#allocation8 + $0x638] sm:$0xff] }
 0x14b   :  { %2275 = vmatpush2.bf16.msra.mxu0 %v2809_v34  ;;  %v2769_v21 = vcombine.low %v356_v13, %v360_v17  ;;  %v2770_v22 = vcombine.high %v356_v13, %v360_v17  ;;  %v255_v13 = vld [vmem:[#allocation8 + $0x2f0] sm:$0xff] }
 0x14c   :  { %2276 = vmatprep.subr.bf16.mxu0 %v2802_v49  ;;  %v2592_v49 = vcombine.high %v179_v42, %v183_v43 }
 0x14d   :  { %2066 = vmatpush2.bf16.msra.mxu1 %v2693_v24  ;;  %v2632_v24 = vcombine.high %v219_v19, %v223_v20  ;;  %v243_v19 = vld [vmem:[#allocation8 + $0x290] sm:$0xff] }
 0x14e   :  { %2067 = vmatprep.subr.bf16.mxu1 %v2686_v26  ;;  %v215_v26 = vld [vmem:[#allocation8 + $0x1b0] sm:$0xff] }
 0x14f   :  { %2277 = vmatpush2.bf16.msra.mxu0 %v2801_v47  ;;  %v2624_v28 = vcombine.high %v211_v25, %v215_v26  ;;  %v2623_v32 = vcombine.low %v211_v25, %v215_v26  ;;  %v247_v20 = vld [vmem:[#allocation8 + $0x2b0] sm:$0xff] }
 0x150   :  { %2278 = vmatprep.subr.bf16.mxu0 %v2794_v59  ;;  %v2576_v59 = vcombine.high %v163_v56, %v167_v57  ;;  %v2655_v25 = vcombine.low %v243_v19, %v247_v20 }
 0x151   :  { %2068 = vmatpush2.bf16.msra.mxu1 %v2685_v31 }
 0x152   :  { %2069 = vmatprep.subr.bf16.mxu1 %v2678_v33 }
 0x153   :  { %2279 = vmatpush2.bf16.msra.mxu0 %v2793_v58 }
 0x154   :  { %2280 = vmatprep.subr.bf16.mxu0 %v2786_v3  ;;  %v2688_v3 = vcombine.high %v275_v0, %v279_v1 }
 0x155   :  { %2070 = vmatpush2.bf16.msra.mxu1 %v2677_v36  ;;  %v187_v36 = vld [vmem:[#allocation8 + $0xd0] sm:$0xff] }
 0x156   :  { %2071 = vmatprep.subr.bf16.mxu1 %v2670_v38  ;;  %v2607_v38 = vcombine.low %v195_v46, %v199_v50  ;;  %v2600_v41 = vcombine.high %v187_v36, %v191_v37  ;;  %v2599_v47 = vcombine.low %v187_v36, %v191_v37  ;;  %v204_v37 = vld [vmem:[#allocation8 + $0x158] sm:$0xff] }
 0x157   :  { %2281 = vmatpush2.bf16.msra.mxu0 %v2785_v2 }
 0x158   :  { %2282 = vmatprep.subr.bf16.mxu0 %v2778_v11  ;;  %v2672_v11 = vcombine.high %v259_v8, %v263_v9 }
 0x159   :  { %2072 = vmatpush2.bf16.msra.mxu1 %v2669_v51  ;;  %v171_v51 = vld [vmem:[#allocation8 + $0x50] sm:$0xff] }
 0x15a   :  { %2073 = vmatprep.subr.bf16.mxu1 %v2662_v54  ;;  %v2591_v54 = vcombine.low %v179_v42, %v183_v43  ;;  %v2584_v55 = vcombine.high %v171_v51, %v175_v52  ;;  %v2583_v58 = vcombine.low %v171_v51, %v175_v52  ;;  %v200_v51 = vld [vmem:[#allocation8 + $0x138] sm:$0xff] }
 0x15b   :  { %2283 = vmatpush2.bf16.msra.mxu0 %v2777_v10 }
 0x15c   :  { %2284 = vmatprep.subr.bf16.mxu0 %v2770_v22  ;;  %v2656_v22 = vcombine.high %v243_v19, %v247_v20  ;;  %v272_v19 = vld [vmem:[#allocation8 + $0x378] sm:$0xff] }
 0x15d   :  { %2074 = vmatpush2.bf16.msra.mxu1 %v2661_v60  ;;  %v283_v60 = vld [vmem:[#allocation8 + $0x3d0] sm:$0xff] }
 0x15e   :  { %2075 = vmatprep.subr.bf16.mxu1 %v2654_v62  ;;  %v2575_v62 = vcombine.low %v163_v56, %v167_v57  ;;  %v2696_v63 = vcombine.high %v283_v60, %v287_v61  ;;  %v2695_v2 = vcombine.low %v283_v60, %v287_v61  ;;  %v188_v56 = vld [vmem:[#allocation8 + $0xd8] sm:$0xff] }
 0x15f   :  { %2285 = vmatpush2.bf16.msra.mxu0 %v2769_v21  ;;  %v192_v57 = vld [vmem:[#allocation8 + $0xf8] sm:$0xff] }
 0x160   :  { %v180_v60 = vld [vmem:[#allocation8 + $0x98] sm:$0xff] }
 0x161   :  { %2076 = vmatpush2.bf16.msra.mxu1 %v2653_v4  ;;  %v267_v4 = vld [vmem:[#allocation8 + $0x350] sm:$0xff]  ;;  %v184_v61 = vld [vmem:[#allocation8 + $0xb8] sm:$0xff] }
 0x162   :  { %2077 = vmatprep.subr.bf16.mxu1 %v2646_v6  ;;  %v3181_v39 = vpop.f32.mrf.mxu0  ;;  %2287 = vmatmul.mubr.bf16.vlgmr.msra.gmra.mxu0 %v3141_v44  ;;  %v2608_v44 = vcombine.high %v195_v46, %v199_v50  ;;  %v2687_v6 = vcombine.low %v275_v0, %v279_v1  ;;  %v2680_v7 = vcombine.high %v267_v4, %v271_v5  ;;  %v212_v50 = vld [vmem:[#allocation8 + $0x198] sm:$0xff] }
 0x163   :  { %v2679_v10 = vcombine.low %v267_v4, %v271_v5  ;;  %v176_v0 = vld [vmem:[#allocation8 + $0x78] sm:$0xff]  ;;  %v2593_v1 = vcombine.low %v180_v60, %v184_v61 }
 0x164   :  { %v3184_v31 = vpop.f32.mrf.mxu0  ;;  %v168_v4 = vld [vmem:[#allocation8 + $0x38] sm:$0xff] }
 0x165   :  { %2078 = vmatpush2.bf16.msra.mxu1 %v2645_v12  ;;  %v251_v12 = vld [vmem:[#allocation8 + $0x2d0] sm:$0xff] }
 0x166   :  { %2079 = vmatprep.subr.bf16.mxu1 %v2638_v16  ;;  %v2046_v33 = vpop.f32.mrf.mxu0  ;;  %v2671_v16 = vcombine.low %v259_v8, %v263_v9  ;;  %v2664_v17 = vcombine.high %v251_v12, %v255_v13  ;;  %v2663_v21 = vcombine.low %v251_v12, %v255_v13  ;;  %v288_v8 = vld [vmem:[#allocation8 + $0x3f8] sm:$0xff] }
 0x167   :  { %v224_v33 = vld [vmem:[#allocation8 + $0x1f8] sm:$0xff] }
 0x168   :  { %v2047_v34 = vpop.f32.mrf.mxu0  ;;  %v280_v12 = vld [vmem:[#allocation8 + $0x3b8] sm:$0xff] }
 0x169   :  { %2080 = vmatpush2.bf16.msra.mxu1 %v2637_v23  ;;  %v235_v23 = vld [vmem:[#allocation8 + $0x250] sm:$0xff]  ;;  %v216_v34 = vld [vmem:[#allocation8 + $0x1b8] sm:$0xff] }
 0x16a   :  { %2131 = vmatprep.subr.bf16.mxu1 %v2632_v24  ;;  %v239_v24 = vld [vmem:[#allocation8 + $0x270] sm:$0xff]  ;;  %v2626_v36 = vcombine.high %v212_v50, %v216_v34  ;;  %v2625_v42 = vcombine.low %v212_v50, %v216_v34  ;;  %v240_v50 = vld [vmem:[#allocation8 + $0x278] sm:$0xff] }
 0x16b   :  { %v2648_v26 = vcombine.high %v235_v23, %v239_v24  ;;  %v2647_v29 = vcombine.low %v235_v23, %v239_v24  ;;  %v264_v23 = vld [vmem:[#allocation8 + $0x338] sm:$0xff] }
 0x16c   :  { %2082 = vmatmul.mubr.bf16.vlgmr.msra.gmra.mxu1 %v3172_v18 }
 0x16d   :  { %2132 = vmatpush1.bf16.msra.mxu1 %v2631_v27  ;;  %2163 = vmatprep.mubr.bf16.mxu1 %v3169_v15  ;;  %v227_v27 = vld [vmem:[#allocation8 + $0x210] sm:$0xff] }
 0x16e   :  { %2133 = vmatprep.subr.bf16.mxu1 %v2624_v28  ;;  %v231_v28 = vld [vmem:[#allocation8 + $0x230] sm:$0xff] }
 0x16f   :  { %v2640_v30 = vcombine.high %v227_v27, %v231_v28 }
 0x171   :  { %2134 = vmatpush1.bf16.msra.mxu1 %v2623_v32  ;;  %v220_v32 = vld [vmem:[#allocation8 + $0x1d8] sm:$0xff] }
 0x172   :  { %2135 = vmatprep.subr.bf16.mxu1 %v2616_v45  ;;  %v2639_v45 = vcombine.low %v227_v27, %v231_v28  ;;  %v2634_v46 = vcombine.high %v220_v32, %v224_v33  ;;  %v256_v27 = vld [vmem:[#allocation8 + $0x2f8] sm:$0xff] }
 0x175   :  { %2136 = vmatpush1.bf16.msra.mxu1 %v2615_v35  ;;  %v2633_v35 = vcombine.low %v220_v32, %v224_v33  ;;  %v248_v32 = vld [vmem:[#allocation8 + $0x2b8] sm:$0xff] }
 0x176   :  { %2137 = vmatprep.subr.bf16.mxu1 %v2608_v44 }
 0x179   :  { %2138 = vmatpush1.bf16.msra.mxu1 %v2607_v38  ;;  %v208_v38 = vld [vmem:[#allocation8 + $0x178] sm:$0xff] }
 0x17a   :  { %2139 = vmatprep.subr.bf16.mxu1 %v2600_v41 }
 0x17d   :  { %2140 = vmatpush1.bf16.msra.mxu1 %v2599_v47  ;;  %v2618_v47 = vcombine.high %v204_v37, %v208_v38 }
 0x17e   :  { %2141 = vmatprep.subr.bf16.mxu1 %v2592_v49  ;;  %v196_v49 = vld [vmem:[#allocation8 + $0x118] sm:$0xff] }
 0x181   :  { %2142 = vmatpush1.bf16.msra.mxu1 %v2591_v54  ;;  %v2617_v54 = vcombine.low %v204_v37, %v208_v38  ;;  %v232_v37 = vld [vmem:[#allocation8 + $0x238] sm:$0xff] }
 0x182   :  { %2143 = vmatprep.subr.bf16.mxu1 %v2584_v55  ;;  %v2610_v55 = vcombine.high %v196_v49, %v200_v51 }
 0x185   :  { %2144 = vmatpush1.bf16.msra.mxu1 %v2583_v58  ;;  %v2609_v58 = vcombine.low %v196_v49, %v200_v51 }
 0x186   :  { %2145 = vmatprep.subr.bf16.mxu1 %v2576_v59  ;;  %v2602_v59 = vcombine.high %v188_v56, %v192_v57 }
 0x189   :  { %2146 = vmatpush1.bf16.msra.mxu1 %v2575_v62  ;;  %v2594_v62 = vcombine.high %v180_v60, %v184_v61 }
 0x18a   :  { %2147 = vmatprep.subr.bf16.mxu1 %v2696_v63  ;;  %v172_v63 = vld [vmem:[#allocation8 + $0x58] sm:$0xff] }
 0x18b   :  { %v2585_v5 = vcombine.low %v172_v63, %v176_v0 }
 0x18d   :  { %2148 = vmatpush2.bf16.msra.mxu1 %v2695_v2  ;;  %v2586_v2 = vcombine.high %v172_v63, %v176_v0 }
 0x18e   :  { %2149 = vmatprep.subr.bf16.mxu1 %v2688_v3  ;;  %v164_v3 = vld [vmem:[#allocation8 + $0x18] sm:$0xff] }
 0x18f   :  { %v2577_v9 = vcombine.low %v164_v3, %v168_v4 }
 0x191   :  { %2150 = vmatpush2.bf16.msra.mxu1 %v2687_v6  ;;  %v2578_v6 = vcombine.high %v164_v3, %v168_v4 }
 0x192   :  { %2151 = vmatprep.subr.bf16.mxu1 %v2680_v7  ;;  %v284_v7 = vld [vmem:[#allocation8 + $0x3d8] sm:$0xff] }
 0x193   :  { %v2697_v13 = vcombine.low %v284_v7, %v288_v8 }
 0x195   :  { %2152 = vmatpush2.bf16.msra.mxu1 %v2679_v10  ;;  %v2698_v10 = vcombine.high %v284_v7, %v288_v8 }
 0x196   :  { %2153 = vmatprep.subr.bf16.mxu1 %v2672_v11  ;;  %v276_v11 = vld [vmem:[#allocation8 + $0x398] sm:$0xff] }
 0x197   :  { %v2689_v20 = vcombine.low %v276_v11, %v280_v12 }
 0x199   :  { %2154 = vmatpush2.bf16.msra.mxu1 %v2671_v16  ;;  %v2690_v16 = vcombine.high %v276_v11, %v280_v12 }
 0x19a   :  { %2155 = vmatprep.subr.bf16.mxu1 %v2664_v17  ;;  %v268_v17 = vld [vmem:[#allocation8 + $0x358] sm:$0xff] }
 0x19b   :  { %v2681_v24 = vcombine.low %v268_v17, %v272_v19 }
 0x19d   :  { %2156 = vmatpush2.bf16.msra.mxu1 %v2663_v21  ;;  %v2682_v21 = vcombine.high %v268_v17, %v272_v19 }
 0x19e   :  { %2157 = vmatprep.subr.bf16.mxu1 %v2656_v22  ;;  %v260_v22 = vld [vmem:[#allocation8 + $0x318] sm:$0xff] }
 0x19f   :  { %v2673_v28 = vcombine.low %v260_v22, %v264_v23 }
 0x1a1   :  { %2158 = vmatpush2.bf16.msra.mxu1 %v2655_v25  ;;  %v2674_v25 = vcombine.high %v260_v22, %v264_v23  ;;  %v665_v22 = vsub.s32 4, %v3156_v40 }
 0x1a2   :  { %2159 = vmatprep.subr.bf16.mxu1 %v2648_v26  ;;  %v3188_v44 = vpop.f32.mrf.mxu0  ;;  %v252_v26 = vld [vmem:[#allocation8 + $0x2d8] sm:$0xff] }
 0x1a3   :  { %v2665_v33 = vcombine.low %v252_v26, %v256_v27 }
 0x1a4   :  { %v3190_v41 = vpop.f32.mrf.mxu0 }
 0x1a5   :  { %2160 = vmatpush2.bf16.msra.mxu1 %v2647_v29  ;;  %v2666_v29 = vcombine.high %v252_v26, %v256_v27 }
 0x1a6   :  { %2161 = vmatprep.subr.bf16.mxu1 %v2640_v30  ;;  %v2128_v43 = vpop.f32.mrf.mxu0  ;;  %v244_v30 = vld [vmem:[#allocation8 + $0x298] sm:$0xff] }
 0x1a7   :  { %v2657_v34 = vcombine.low %v244_v30, %v248_v32 }
 0x1a8   :  { %v2129_v52 = vpop.f32.mrf.mxu0 }
 0x1a9   :  { %2162 = vmatpush2.bf16.msra.mxu1 %v2639_v45  ;;  %v2658_v45 = vcombine.high %v244_v30, %v248_v32 }
 0x1aa   :  { %2213 = vmatprep.subr.bf16.mxu1 %v2634_v46  ;;  %v236_v46 = vld [vmem:[#allocation8 + $0x258] sm:$0xff] }
 0x1ab   :  { %v2649_v38 = vcombine.low %v236_v46, %v240_v50 }
 0x1ac   :  { %2164 = vmatmul.mubr.bf16.vlgmr.msra.gmra.mxu1 %v3172_v18 }
 0x1ad   :  { %2214 = vmatpush1.bf16.msra.mxu1 %v2633_v35  ;;  %2245 = vmatprep.mubr.bf16.mxu1 %v3169_v15  ;;  %v2601_v15 = vcombine.low %v188_v56, %v192_v57  ;;  %v2650_v35 = vcombine.high %v236_v46, %v240_v50 }
 0x1ae   :  { %2215 = vmatprep.subr.bf16.mxu1 %v2626_v36  ;;  %v228_v36 = vld [vmem:[#allocation8 + $0x218] sm:$0xff] }
 0x1af   :  { %v2641_v43 = vcombine.low %v228_v36, %v232_v37 }
 0x1b1   :  { %2216 = vmatpush1.bf16.msra.mxu1 %v2625_v42  ;;  %v2642_v42 = vcombine.high %v228_v36, %v232_v37  ;;  %v127_v36 = vld [vmem:[%s101_s26] sm:$0xff] }
 0x1b2   :  { %2217 = vmatprep.subr.bf16.mxu1 %v2618_v47 }
 0x1b5   :  { %2218 = vmatpush1.bf16.msra.mxu1 %v2617_v54 }
 0x1b6   :  { %2219 = vmatprep.subr.bf16.mxu1 %v2610_v55 }
 0x1b9   :  { %2220 = vmatpush1.bf16.msra.mxu1 %v2609_v58 }
 0x1ba   :  { %2221 = vmatprep.subr.bf16.mxu1 %v2602_v59 }
 0x1bd   :  { %2222 = vmatpush1.bf16.msra.mxu1 %v2601_v15 }
 0x1be   :  { %2223 = vmatprep.subr.bf16.mxu1 %v2594_v62 }
 0x1c1   :  { %2224 = vmatpush1.bf16.msra.mxu1 %v2593_v1  ;;  %v657_v1 = vsub.s32 2, %v3156_v40 }
 0x1c2   :  { %2225 = vmatprep.subr.bf16.mxu1 %v2586_v2  ;;  %v661_v2 = vsub.s32 3, %v3156_v40 }
 0x1c5   :  { %2226 = vmatpush1.bf16.msra.mxu1 %v2585_v5 }
 0x1c6   :  { %2227 = vmatprep.subr.bf16.mxu1 %v2578_v6 }
 0x1c9   :  { %2228 = vmatpush1.bf16.msra.mxu1 %v2577_v9 }
 0x1ca   :  { %2229 = vmatprep.subr.bf16.mxu1 %v2698_v10 }
 0x1cd   :  { %2230 = vmatpush2.bf16.msra.mxu1 %v2697_v13 }
 0x1ce   :  { %2231 = vmatprep.subr.bf16.mxu1 %v2690_v16 }
 0x1d1   :  { %2232 = vmatpush2.bf16.msra.mxu1 %v2689_v20 }
 0x1d2   :  { %2233 = vmatprep.subr.bf16.mxu1 %v2682_v21 }
 0x1d5   :  { %2234 = vmatpush2.bf16.msra.mxu1 %v2681_v24 }
 0x1d6   :  { %2235 = vmatprep.subr.bf16.mxu1 %v2674_v25 }
 0x1d9   :  { %2236 = vmatpush2.bf16.msra.mxu1 %v2673_v28 }
 0x1da   :  { %2237 = vmatprep.subr.bf16.mxu1 %v2666_v29 }
 0x1dd   :  { %2238 = vmatpush2.bf16.msra.mxu1 %v2665_v33 }
 0x1de   :  { %2239 = vmatprep.subr.bf16.mxu1 %v2658_v45 }
 0x1e1   :  { %2240 = vmatpush2.bf16.msra.mxu1 %v2657_v34 }
 0x1e2   :  { %2241 = vmatprep.subr.bf16.mxu1 %v2650_v35  ;;  %v2206_v47 = vpop.f32.mrf.mxu0 }
 0x1e4   :  { %v3194_v49 = vpop.f32.mrf.mxu0 }
 0x1e5   :  { %2242 = vmatpush2.bf16.msra.mxu1 %v2649_v38 }
 0x1e6   :  { %2243 = vmatprep.subr.bf16.mxu1 %v2642_v42  ;;  %v2210_v52 = vpop.f32.mrf.mxu0 }
 0x1e8   :  { %v2211_v55 = vpop.f32.mrf.mxu0 }
 0x1e9   :  { %2244 = vmatpush2.bf16.msra.mxu1 %v2641_v43  ;;  %v2334_v43 = vcombine.high %v127_v36, %v127_v36 }
 0x1ec   :  { %2246 = vmatmul.mubr.bf16.vlgmr.msra.gmra.mxu1 %v3172_v18  ;;  %v2001_v51 = vpop.f32.mrf.mxu1  ;;  %v3204_v18 = vld [vmem:[%s3299_s7] sm:$0xff]  ;;  %s108_s7 = scalar_lea.vmem %s3305_s13, %s3229_s23 }
 0x1ed   :  { %v650_v3 = vrot.slane %v3204_v18, %v3159_v48  ;;  %v658_v4 = vrot.slane %v3204_v18, %v657_v1  ;;  %v662_v5 = vrot.slane %v3204_v18, %v661_v2  ;;  %v654_v7 = vrot.slane %v3204_v18, %v3165_v53 }
 0x1ee   :  { %v2003_v54 = vpop.f32.mrf.mxu1 }
 0x1ef   :  { %v2002_v6 = vadd.f32 %v2001_v51, %v650_v3  ;;  %v2004_v11 = vadd.f32 %v2003_v54, %v654_v7 }
 0x1f0   :  { %v2005_v56 = vpop.f32.mrf.mxu1 }
 0x1f1   :  { %v2043_v10 = vadd.f32 %v3181_v39, %v2002_v6  ;;  %v2045_v17 = vadd.f32 %v3184_v31, %v2004_v11  ;;  %v669_v39 = vsub.s32 5, %v3156_v40 }
 0x1f2   :  { %v2006_v57 = vpop.f32.mrf.mxu1 }
 0x1f3   :  { %v2827_v16 = vmul.f32 -1.442695, %v2043_v10  ;;  %v2828_v21 = vmul.f32 -1.442695, %v2045_v17  ;;  %v670_v31 = vrot.slane %v3204_v18, %v669_v39  ;;  %v122_v39 = vld [vmem:[%s3294_s2 + $0x18] sm:$0xff] }
 0x1f5   :  { %2901 = vpow2.f32 %v2827_v16 }
 0x202   :  { %v2902_v23 = vpop.eup %2901 }
 0x222   :  { %v3197_v58 = vpop.f32.mrf.mxu0 }
 0x224   :  { %v3199_v60 = vpop.f32.mrf.mxu0 }
 0x226   :  { %v2292_v15 = vpop.f32.mrf.mxu0 }
 0x227   :  { %v673_v15 = vsub.s32 6, %v3156_v40 }
 0x228   :  { %v2293_v63 = vpop.f32.mrf.mxu0 }
 0x229   :  { %v674_v63 = vrot.slane %v3204_v18, %v673_v15 }
 0x22c   :  { %v2083_v59 = vpop.f32.mrf.mxu1 }
 0x22d   :  { %v2084_v8 = vadd.f32 %v2083_v59, %v658_v4 }
 0x22e   :  { %v2085_v61 = vpop.f32.mrf.mxu1 }
 0x22f   :  { %v2086_v9 = vadd.f32 %v2085_v61, %v662_v5  ;;  %v2125_v12 = vadd.f32 %v3188_v44, %v2084_v8  ;;  %v666_v44 = vrot.slane %v3204_v18, %v665_v22 }
 0x230   :  { %v2087_v62 = vpop.f32.mrf.mxu1 }
 0x231   :  { %v2127_v13 = vadd.f32 %v3190_v41, %v2086_v9  ;;  %v2829_v19 = vmul.f32 -1.442695, %v2125_v12  ;;  %v2301_v41 = vadd.f32 1.0, %v2902_v23  ;;  %v677_v62 = vsub.s32 7, %v3156_v40  ;;  %v119_v40 = vld [vmem:[%s3294_s2] sm:$0xff]  ;;  %v121_v12 = vld [vmem:[%s3294_s2 + $0x10] sm:$0xff] }
 0x232   :  { %v2088_v0 = vpop.f32.mrf.mxu1  ;;  %v2350_v11 = vcombine.high %v119_v40, %v119_v40 }
 0x233   :  { %v2830_v20 = vmul.f32 -1.442695, %v2127_v13  ;;  %2903 = vpow2.f32 %v2829_v19  ;;  %v678_v0 = vrot.slane %v3204_v18, %v677_v62  ;;  %v120_v18 = vld [vmem:[%s3294_s2 + $0x8] sm:$0xff]  ;;  %v2359_v13 = vsel %vm2358_vm0, %v119_v40, 0.0 }
 0x234   :  { %v2360_v16 = vsel %vm2358_vm0, %v120_v18, 0.0 }
 0x235   :  { %2905 = vpow2.f32 %v2830_v20  ;;  %v2352_v20 = vcombine.high %v121_v12, %v121_v12 }
 0x236   :  { %2907 = vpow2.f32 %v2828_v21  ;;  %v2366_v21 = vsel %vm2358_vm0, %v2350_v11, 0.0 }
 0x237   :  { %2909 = vrcp.f32 %v2301_v41  ;;  %v2353_v41 = vcombine.high %v122_v39, %v122_v39 }
 0x240   :  { %v2904_v24 = vpop.eup %2903 }
 0x241   :  { %v2313_v27 = vadd.f32 1.0, %v2904_v24  ;;  %v2361_v24 = vadd.f32 %v2360_v16, %v2359_v13 }
 0x242   :  { %v2906_v25 = vpop.eup %2905 }
 0x243   :  { %v2908_v26 = vpop.eup %2907  ;;  %v2314_v28 = vadd.f32 1.0, %v2906_v25  ;;  %2911 = vrcp.f32 %v2313_v27  ;;  %v2362_v25 = vsel %vm2358_vm0, %v121_v12, 0.0 }
 0x244   :  { %v2302_v32 = vadd.f32 1.0, %v2908_v26  ;;  %v2910_v37 = vpop.eup %2909  ;;  %v2369_v26 = vsel %vm2358_vm0, %v2352_v20, 0.0  ;;  %v2363_v27 = vadd.f32 %v2362_v25, %v2361_v24 }
 0x245   :  { %2913 = vrcp.f32 %v2314_v28  ;;  %v418_v28 = vld [vmem:[%s3300_s8] sm:$0x3] }
 0x250   :  { %v2912_v38 = vpop.eup %2911 }
 0x251   :  { %v2336_v54 = vmul.f32 %v2912_v38, %v127_v36 }
 0x252   :  { %v2914_v42 = vpop.eup %2913 }
 0x253   :  { %v2337_v55 = vmul.f32 %v2914_v42, %v2334_v43 }
 0x26c   :  { %v2165_v29 = vpop.f32.mrf.mxu1 }
 0x26d   :  { %v2166_v30 = vadd.f32 %v2165_v29, %v666_v44 }
 0x26e   :  { %v2167_v33 = vpop.f32.mrf.mxu1 }
 0x26f   :  { %v2207_v45 = vadd.f32 %v2206_v47, %v2166_v30  ;;  %v2168_v46 = vadd.f32 %v2167_v33, %v670_v31  ;;  %v2364_v31 = vsel %vm2358_vm0, %v122_v39, 0.0  ;;  %v2371_v30 = vsel %vm2358_vm0, %v2353_v41, 0.0 }
 0x270   :  { %v2169_v50 = vpop.f32.mrf.mxu1  ;;  %v2394_v33 = vrot.slane %v418_v28, %v3159_v48  ;;  %v2936_v48 = vld [vmem:[%s3293_s1] sm:$0xff]  ;;  %s3031_s1 = smov [#allocation10]  }
 0x271   :  { %2915 = vtanh.f32 %v2207_v45  ;;  %v2209_v34 = vadd.f32 %v3194_v49, %v2168_v46  ;;  %v2398_v45 = vrot.slane %v418_v28, %v3165_v53  ;;  %s2459_s13 = sshll.u32 %s3031_s1, 4  ;;  %s2460_s13 = int_to_ptr.vmem [resolvable:$true] %s2459_s13 }
 0x272   :  { %2917 = vrcp.f32 %v2302_v32  ;;  %v2170_v35 = vpop.f32.mrf.mxu1  ;;  %v2365_v32 = vadd.f32 %v2364_v31, %v2363_v27  ;;  %p2982_p12 = scmp.lt.s32.totalorder %s2460_s13, %s2460_s13 }
 0x273   :  { %2919 = vtanh.f32 %v2209_v34  ;;  %v2935_v34 = vld [vmem:[%s3132_s17] sm:$0xff]  ;;  %v2399_v36 = vcombine.low %v2394_v33, %v2398_v45  ;;  %s2977_s17 = scalar_lea.vmem %s2460_s13, 128 }
 0x274   :  { %v2373_v35 = vsub.f32 %v2365_v32, %v2935_v34  ;;  %p2978_p11 = scmp.ne.s32.totalorder %s2460_s13, %s2977_s17  ;;  %p2983_p13 = scmp.lt.s32.totalorder %s2977_s17, %s2977_s17 }
 0x276   :  { %p2984_p0 = por %p2983_p13, %p2982_p12 }
 0x278   :  { %p2985_p1 = pnand %p2984_p0, %p2978_p11 }
 0x27e   :  { %v2916_v47 = vpop.eup %2915 }
 0x27f   :  { %v2918_v51 = vpop.eup %2917  ;;  %v2338_v52 = vmul.f32 %v2916_v47, %v2910_v37 }
 0x280   :  { %v2920_v49 = vpop.eup %2919 }
 0x281   :  { %v2339_v56 = vmul.f32 %v2920_v49, %v2918_v51  ;;  %v2340_v57 = vadd.f32 %v2338_v52, %v2336_v54  ;;  %v2401_v49 = vmul.f32 %v2936_v48, %v2399_v36 }
 0x283   :  { %v2341_v59 = vadd.f32 %v2339_v56, %v2337_v55  ;;  %v2405_v62 = vsel %vm2358_vm0, %v2401_v49, 0.0 }
 0x285   :  { %v2436_v61 = vcombine.low %v2340_v57, %v2341_v59 }
 0x287   :  { %2438 = vst [vmem:[%s115_s4] sm:$0xff] %v2436_v61 }
 0x2ac   :  { %v2247_v1 = vpop.f32.mrf.mxu1 }
 0x2ad   :  { %v2248_v2 = vadd.f32 %v2247_v1, %v674_v63 }
 0x2ae   :  { %v2249_v3 = vpop.f32.mrf.mxu1 }
 0x2af   :  { %v2289_v4 = vadd.f32 %v3197_v58, %v2248_v2  ;;  %v2250_v5 = vadd.f32 %v2249_v3, %v678_v0  ;;  %v2351_v58 = vcombine.high %v120_v18, %v120_v18 }
 0x2b0   :  { %v2251_v6 = vpop.f32.mrf.mxu1 }
 0x2b1   :  { %v2831_v7 = vmul.f32 -1.442695, %v2289_v4  ;;  %v2291_v8 = vadd.f32 %v3199_v60, %v2250_v5  ;;  %v2367_v22 = vsel %vm2358_vm0, %v2351_v58, 0.0 }
 0x2b2   :  { %v2252_v9 = vpop.f32.mrf.mxu1  ;;  %v2368_v44 = vadd.f32 %v2367_v22, %v2366_v21 }
 0x2b3   :  { %2921 = vpow2.f32 %v2831_v7  ;;  %v2832_v10 = vmul.f32 -1.442695, %v2291_v8 }
 0x2b4   :  { %v2370_v29 = vadd.f32 %v2369_v26, %v2368_v44 }
 0x2b5   :  { %2923 = vpow2.f32 %v2832_v10 }
 0x2b6   :  { %2925 = vtanh.f32 %v2340_v57  ;;  %v2372_v46 = vadd.f32 %v2371_v30, %v2370_v29 }
 0x2b8   :  { %v2374_v43 = vsub.f32 %v2372_v46, %v3135_v14 }
 0x2c0   :  { %v2922_v60 = vpop.eup %2921 }
 0x2c1   :  { %v2327_v17 = vadd.f32 1.0, %v2922_v60 }
 0x2c2   :  { %v2924_v19 = vpop.eup %2923 }
 0x2c3   :  { %2927 = vrcp.f32 %v2327_v17  ;;  %v2328_v23 = vadd.f32 1.0, %v2924_v19  ;;  %v2926_v50 = vpop.eup %2925 }
 0x2c4   :  { %2929 = vtanh.f32 %v2341_v59  ;;  %v2403_v59 = vcombine.high %v2401_v49, %v2401_v49 }
 0x2c5   :  { %2931 = vrcp.f32 %v2328_v23 }
 0x2c6   :  { %v2406_v63 = vsel %vm2358_vm0, %v2403_v59, 0.0 }
 0x2c7   :  { %v2407_v1 = vadd.f32 %v2406_v63, %v2405_v62 }
 0x2d0   :  { %v2928_v37 = vpop.eup %2927 }
 0x2d1   :  { %v2930_v38 = vpop.eup %2929  ;;  %v2344_v42 = vmul.f32 %v2928_v37, %v2926_v50 }
 0x2d2   :  { %v2932_v47 = vpop.eup %2931 }
 0x2d3   :  { %v2345_v51 = vmul.f32 %v2932_v47, %v2930_v38  ;;  %v2375_v52 = vadd.f32 %v2373_v35, %v2344_v42 }
 0x2d5   :  { %v2376_v53 = vadd.f32 %v2374_v43, %v2345_v51  ;;  %v2377_v54 = vmul.f32 0.25, %v2375_v52  ;;  %v2431_v55 = vcombine.low %v2344_v42, %v2345_v51 }
 0x2d7   :  { %v2378_v56 = vmul.f32 0.25, %v2376_v53  ;;  %v2379_v57 = vmul.f32 %v2377_v54, %v2377_v54  ;;  %2433 = vst [vmem:[%s108_s7] sm:$0xff] %v2431_v55 }
 0x2d9   :  { %v2380_v14 = vmul.f32 %v2378_v56, %v2378_v56  ;;  %v2381_v61 = vsel %vm2358_vm0, %v2379_v57, 0.0 }
 0x2db   :  { %v2382_v15 = vsel %vm2358_vm0, %v2380_v14, 0.0 }
 0x2dc   :  { %v2383_v0 = vadd.f32 %v2382_v15, %v2381_v61 }
 0x2de   :  { %2384 = vadd.xlane.f32.xlu0 %v2383_v0 }
 0x2e2   :  { %2408 = vadd.xlane.f32.xlu0 %v2407_v1 }
 0x2e3   :  { %2988 = shalt.err (!%p2985_p1)
}
 0x2e4   :  { %2462 = dma.vmem_to_hbm [thread:$0]  %s2460_s13, 128, %s3303_s11, [#allocation7]   ;;  %v2833_v4 = vld [vmem:[#allocation4] ss:$0 sm:$0xff]  ;;  %vm2427_vm1 = vcmask 3072  }
 0x2e5   :  { %s3032_s24 = smov [#allocation11]  }
 0x2e6   :  { %s2469_s25 = sshll.u32 %s3032_s24, 4  ;;  %s2470_s25 = int_to_ptr.vmem [resolvable:$true] %s2469_s25 }
 0x2e7   :  { %s2997_s11 = scalar_lea.vmem %s2470_s25, 128  ;;  %p3002_p3 = scmp.lt.s32.totalorder %s2470_s25, %s2470_s25 }
 0x2e8   :  { %p2998_p2 = scmp.ne.s32.totalorder %s2470_s25, %s2997_s11  ;;  %p3003_p4 = scmp.lt.s32.totalorder %s2997_s11, %s2997_s11 }
 0x2ea   :  { %p3004_p5 = por %p3003_p4, %p3002_p3 }
 0x2ec   :  { %p3005_p6 = pnand %p3004_p5, %p2998_p2 }
 0x367   :  { %v2385_v2 = vpop.xlane.xlu0 %2384 }
 0x368   :  { %v2386_v3 = vmax.f32 %v2385_v2, 1e-24 }
 0x36a   :  { %2933 = vrsqrt.f32 %v2386_v3 }
 0x36b   :  { %v2409_v5 = vpop.xlane.xlu0 %2408 }
 0x36c   :  { %v2416_v6 = vadd.f32 %v2833_v4, %v2409_v5 }
 0x36e   :  { %2428 = vst.msk [vmem:[%s3302_s10] sm:$0xf] %vm2427_vm1, %v2416_v6 }
 0x377   :  { %v2934_v7 = vpop.eup %2933 }
 0x378   :  { %v2388_v8 = vmul.f32 %v2934_v7, %v2377_v54  ;;  %v2389_v9 = vmul.f32 %v2934_v7, %v2378_v56 }
 0x37a   :  { %v2424_v10 = vcombine.low %v2388_v8, %v2389_v9 }
 0x37c   :  { %2426 = vst [vmem:[#allocation11] sm:$0xff] %v2424_v10 }
 0x37d   :  { %3008 = shalt.err (!%p3005_p6)
}
 0x37e   :  { %2472 = dma.vmem_to_hbm [thread:$0]  %s2470_s25, 128, %s3304_s12, [#allocation12]  }
 0x37f   :  { %3021 = dma.done.wait [#allocation7], 128  }
 0x380   :  { %3022 = vsyncadd [#allocation7], 4294967168 }
 0x381   :  { %3023 = dma.done.wait [#allocation12], 128  }
 0x382   :  { %3024 = vsyncadd [#allocation12], 4294967168 }
 0x383   :  { %2503 = vsyncpa [#allocation6], 1 }
 0x384   :  { %2504 = vsyncpa [#allocation9], 1 }
 0x385   :  { %2505 = vsyncpa [#allocation7], 1 }
 0x386   :  { %2506 = vsyncpa [#allocation12], 1 }

</bundles_post_ra>
